<compile_context>
chip_gen: v7x
topology: tpu7x:2x2x1
jax: 0.10.0
libtpu: 0.0.40
codegen_flags: <defaults>
</compile_context>

<pallas_src>
import functools

import jax
import jax.numpy as jnp
from jax.experimental import pallas as pl
from jax.experimental.pallas import tpu as pltpu

COMPUTE_DTYPE = jnp.bfloat16  # MXU operand dtype; accumulation stays f32.


# ----------------------------------------------------------------------------
# Fused Pallas kernel: conv1+pool -> conv2+pool -> fc1 -> fc2 -> fc3
# ----------------------------------------------------------------------------
def _lenet_fused_kernel(x_ref, t1_ref, b1_ref, t2_ref, b2_ref,
                        w1_ref, f1b_ref, w2_ref, f2b_ref, w3_ref, f3b_ref,
                        o_ref, *, k):
    """One batch tile of the whole network.

    x_ref : (H=32, B, W*Cin=96)  bf16, H-major, batch on sublanes, lanes = w*3+c
    t*_ref: (2, k, W*Cin, Wp*Cout) bf16 Toeplitz conv slabs, [col-parity, row-tap]
    b*_ref: (1, Wp*Cout) f32 bias tiled across pooled width
    w1_ref: (5, 80, 120) bf16 (fc1 split per pooled row, so no activation transpose)
    w2_ref: (120, 84), w3_ref: (84, 10) bf16;  f*b_ref: (1, out) f32
    o_ref : (B, 10) f32
    """

    def conv_relu_pool(x, t_ref, b_ref):
        # x: (H_in, B, W*Cin) bf16 value.  Computes valid k x k conv + bias + relu +
        # 2x2 max-pool, returning (H_pool, B, Wp*Cout) bf16 in the same H-major layout.
        h_in, b, wc = x.shape
        h_conv = h_in - k + 1                    # conv output rows (must be even)
        wpc = t_ref.shape[-1]                    # Wp * Cout (lane-folded)
        pooled = None
        for pc in (0, 1):                        # pooled-column parity (baked into T)
            acc = None
            for di in range(k):                  # conv row taps -> contiguous slices
                rows = x[di:di + h_conv].reshape(h_conv * b, wc)     # free: b % 8 == 0
                d = jnp.dot(rows, t_ref[pc, di],
                            preferred_element_type=jnp.float32)
                acc = d if acc is None else acc + d
            # Row index of acc is r*B + b with r the conv row; regroup pairs of rows
            # (sublane-tile aligned since B % 8 == 0) and max over the row parity.
            acc = acc.reshape(h_conv // 2, 2 * b, wpc)
            rowmax = jnp.maximum(acc[:, :b, :], acc[:, b:, :])       # (Hp, B, WpC)
            pooled = rowmax if pooled is None else jnp.maximum(pooled, rowmax)
        # Bias is identical across the 4 pool phases and relu commutes with max.
        return jnp.maximum(pooled + b_ref[...], 0.0).astype(COMPUTE_DTYPE)

    xv = x_ref[...]                                           # (32, B, 96) bf16
    y1 = conv_relu_pool(xv, t1_ref, b1_ref)                   # (14, B, 84)  VMEM only
    y2 = conv_relu_pool(y1, t2_ref, b2_ref)                   # (5,  B, 80)  VMEM only

    # fc1: contract over (pooled row, w*16+c); w1_ref is already (5, 80, 120) so the
    # H-major activation needs no transpose -- accumulate 5 per-row dots.
    h = None
    for hh in range(y2.shape[0]):
        d = jnp.dot(y2[hh], w1_ref[hh], preferred_element_type=jnp.float32)
        h = d if h is None else h + d
    h = jnp.maximum(h + f1b_ref[...], 0.0).astype(COMPUTE_DTYPE)          # (B, 120)
    h = jnp.dot(h, w2_ref[...], preferred_element_type=jnp.float32)
    h = jnp.maximum(h + f2b_ref[...], 0.0).astype(COMPUTE_DTYPE)          # (B, 84)
    out = jnp.dot(h, w3_ref[...], preferred_element_type=jnp.float32) + f3b_ref[...]
    o_ref[...] = out.astype(o_ref.dtype)                                  # (B, 10)


# ----------------------------------------------------------------------------
# Pallas wrapper
# ----------------------------------------------------------------------------
def lenet_forward_pallas(p, x, *, b_tile):
    """x: (32, N_pad, 96) bf16 with N_pad a multiple of b_tile -> (N_pad, 10) f32."""
    h, n_pad, wc = x.shape
    grid = (n_pad // b_tile,)

    def const(arr):
        nd = arr.ndim
        return pl.BlockSpec(arr.shape, lambda i, _nd=nd: (0,) * _nd)

    # Actual MXU work (Toeplitz MACs) per image, plus the fc stack.
    flops_per_img = (2 * 2 * 5 * 28 * 96 * 84
                     + 2 * 2 * 5 * 10 * 84 * 80
                     + 2 * (400 * 120 + 120 * 84 + 84 * 10))
    bytes_accessed = (2 * x.size + 4 * n_pad * 10
                      + 2 * (p["conv1_t"].size + p["conv2_t"].size + p["fc1_w"].size
                             + p["fc2_w"].size + p["fc3_w"].size))

    return pl.pallas_call(
        functools.partial(_lenet_fused_kernel, k=5),
        out_shape=jax.ShapeDtypeStruct((n_pad, 10), jnp.float32),
        grid=grid,
        in_specs=[
            pl.BlockSpec((h, b_tile, wc), lambda i: (0, i, 0)),
            const(p["conv1_t"]), const(p["conv1_b"]),
            const(p["conv2_t"]), const(p["conv2_b"]),
            const(p["fc1_w"]), const(p["fc1_b"]),
            const(p["fc2_w"]), const(p["fc2_b"]),
            const(p["fc3_w"]), const(p["fc3_b"]),
        ],
        out_specs=pl.BlockSpec((b_tile, 10), lambda i: (i, 0)),
        compiler_params=pltpu.CompilerParams(dimension_semantics=("parallel",)),
        cost_estimate=pl.CostEstimate(flops=int(flops_per_img) * int(n_pad),
                                      transcendentals=0,
                                      bytes_accessed=int(bytes_accessed)),
    )(x, p["conv1_t"], p["conv1_b"], p["conv2_t"], p["conv2_b"],
      p["fc1_w"], p["fc1_b"], p["fc2_w"], p["fc2_b"], p["fc3_w"], p["fc3_b"])


def _round_up(a, b):
    return (a + b - 1) // b * b


def _pick_batch_tile(n):
    n8 = _round_up(n, 8)
    if n8 >= 128:
        return 64                      # M = 64*28 rows per dot, grid >= 2
    if n8 >= 32:
        return _round_up(n8 // 2, 8)   # keep >= 2 grid steps (v7x: 2 TensorCores)
    return n8                          # tiny batch: single tile


# ----------------------------------------------------------------------------
# One-time parameter preparation (pure JAX, runs once at init)
# ----------------------------------------------------------------------------
def conv_toeplitz(w_oihw, w_in):
    """Toeplitz weight slabs for the lane-folded conv.

    Returns (2, k, W_in*Cin, Wp*Cout) with
      T[pc, di][w*Cin+ci, wp*Cout+co] = W[co, ci, di, w - (2*wp + pc)]  (0 elsewhere)
    so conv output at row r, pooled column wp, column-parity pc is
      sum_di x[r + di, :, :] @ T[pc, di].
    """
    c_out, c_in, k, _ = w_oihw.shape
    w_out = w_in - k + 1
    w_pool = w_out // 2
    w_t = jnp.transpose(w_oihw, (2, 3, 1, 0))               # (k, k, Cin, Cout)
    wp_idx = jnp.arange(w_pool)
    phases = []
    for pc in (0, 1):
        per_di = []
        for di in range(k):
            t = jnp.zeros((w_in, c_in, w_pool, c_out), jnp.float32)
            for dj in range(k):
                rows = 2 * wp_idx + pc + dj
                vals = jnp.broadcast_to(w_t[di, dj], (w_pool, c_in, c_out))
                t = t.at[rows, :, wp_idx, :].set(vals)
            per_di.append(t.reshape(w_in * c_in, w_pool * c_out))
        phases.append(jnp.stack(per_di))
    return jnp.stack(phases)


def prepare_params(params):
    """Reshape / permute weights once so the jitted forward has zero weight plumbing."""
    p = {}
    # conv1: 32x32x3 -> pooled 14x14x6 ; lanes = w*3+c in, wp*6+co out.
    p["conv1_t"] = conv_toeplitz(params["conv1_w"], 32).astype(COMPUTE_DTYPE)
    p["conv1_b"] = jnp.tile(params["conv1_b"], 14).reshape(1, -1).astype(jnp.float32)
    # conv2: 14x14x6 -> pooled 5x5x16 ; lanes = w*6+c in, wp*16+co out.
    p["conv2_t"] = conv_toeplitz(params["conv2_w"], 14).astype(COMPUTE_DTYPE)
    p["conv2_b"] = jnp.tile(params["conv2_b"], 5).reshape(1, -1).astype(jnp.float32)
    # fc1: fold PyTorch's channel-first view(-1, 16*5*5) into a weight permutation and
    # split per pooled row -> (h, w*16+c, out) so the H-major activation is consumed
    # without any transpose inside the kernel.
    w1 = params["fc1_w"].reshape(120, 16, 5, 5)              # (out, c, h, w)
    w1 = jnp.transpose(w1, (2, 3, 1, 0)).reshape(5, 80, 120)  # (h, w*16+c, out)
    p["fc1_w"] = w1.astype(COMPUTE_DTYPE)
    p["fc1_b"] = params["fc1_b"].reshape(1, -1).astype(jnp.float32)
    p["fc2_w"] = params["fc2_w"].T.astype(COMPUTE_DTYPE)      # (120, 84)
    p["fc2_b"] = params["fc2_b"].reshape(1, -1).astype(jnp.float32)
    p["fc3_w"] = params["fc3_w"].T.astype(COMPUTE_DTYPE)      # (84, 10)
    p["fc3_b"] = params["fc3_b"].reshape(1, -1).astype(jnp.float32)
    return p


# ----------------------------------------------------------------------------
# Raw parameters (deterministic, PyTorch shapes / init convention)
# ----------------------------------------------------------------------------
def init_params(key):
    ks = jax.random.split(key, 10)

    def u(k, shape, fan_in):
        bound = 1.0 / jnp.sqrt(fan_in)
        return jax.random.uniform(k, shape, jnp.float32, -bound, bound)

    return {
        "conv1_w": u(ks[0], (6, 3, 5, 5), 3 * 5 * 5),
        "conv1_b": u(ks[1], (6,), 3 * 5 * 5),
        "conv2_w": u(ks[2], (16, 6, 5, 5), 6 * 5 * 5),
        "conv2_b": u(ks[3], (16,), 6 * 5 * 5),
        "fc1_w": u(ks[4], (120, 400), 400),   # PyTorch Linear: (out, in)
        "fc1_b": u(ks[5], (120,), 400),
        "fc2_w": u(ks[6], (84, 120), 120),
        "fc2_b": u(ks[7], (84,), 120),
        "fc3_w": u(ks[8], (10, 84), 84),
        "fc3_b": u(ks[9], (10,), 84),
    }


# ----------------------------------------------------------------------------
# Forward pass: a single pallas_call over batch tiles
# ----------------------------------------------------------------------------
@jax.jit
def net_forward(p, x_nchw):
    n, c, h, w = x_nchw.shape
    assert (h - 4) % 2 == 0 and (w - 4) % 2 == 0, "conv1 output must be even for 2x2 pool"
    assert ((h - 4) // 2 - 4) % 2 == 0 and ((w - 4) // 2 - 4) % 2 == 0
    # NCHW -> (H, N, W*C): H-major so in-kernel conv row taps are contiguous slices,
    # batch on sublanes so (rows, batch) flattens onto the matmul M dim for free.
    xl = jnp.transpose(x_nchw, (2, 0, 3, 1)).reshape(h, n, w * c)
    b_tile = _pick_batch_tile(n)
    n_pad = _round_up(n, b_tile)
    if n_pad != n:
        xl = jnp.pad(xl, ((0, 0), (0, n_pad - n), (0, 0)))
    xl = xl.astype(COMPUTE_DTYPE)
    out = lenet_forward_pallas(p, xl, b_tile=b_tile)          # (N_pad, 10) f32
    return out[:n]


# ----------------------------------------------------------------------------
# Pure-JAX f32 reference (matches the PyTorch module) for a sanity check
# ----------------------------------------------------------------------------
def net_reference(params, x):
    def conv(x, w, b):
        y = jax.lax.conv_general_dilated(x, w, (1, 1), "VALID",
                                         dimension_numbers=("NCHW", "OIHW", "NCHW"))
        return y + b[None, :, None, None]

    def pool(x):
        return jax.lax.reduce_window(x, -jnp.inf, jax.lax.max,
                                     (1, 1, 2, 2), (1, 1, 2, 2), "VALID")

    y = pool(jax.nn.relu(conv(x, params["conv1_w"], params["conv1_b"])))
    y = pool(jax.nn.relu(conv(y, params["conv2_w"], params["conv2_b"])))
    y = y.reshape(y.shape[0], -1)                              # (N, 16*5*5), c-major
    y = jax.nn.relu(y @ params["fc1_w"].T + params["fc1_b"])
    y = jax.nn.relu(y @ params["fc2_w"].T + params["fc2_b"])
    return y @ params["fc3_w"].T + params["fc3_b"]


if __name__ == "__main__":
    key = jax.random.PRNGKey(0)
    pkey, xkey = jax.random.split(key)
    raw_params = init_params(pkey)
    params = prepare_params(raw_params)

    # Input shape implied by the module: 3 channels, 32x32 (so flatten is 16*5*5).
    x = jax.random.normal(xkey, (2, 3, 32, 32), jnp.float32)

    out = jax.block_until_ready(net_forward(params, x))
    assert out.shape == (2, 10) and out.dtype == jnp.float32

    ref = net_reference(raw_params, x)
    err = float(jnp.max(jnp.abs(out - ref)))
    assert err < 5e-2, f"kernel deviates from f32 reference: max abs err = {err}"
    print("KERNEL_OK")
</pallas_src>

<mosaic_0001>
module attributes {stable_mosaic.version = 11 : i64} {
  func.func @_lenet_fused_kernel(%arg0: i32, %arg1: memref<32x8x96xbf16, #tpu.memory_space<vmem>>, %arg2: memref<2x5x96x84xbf16, #tpu.memory_space<vmem>>, %arg3: memref<1x84xf32, #tpu.memory_space<vmem>>, %arg4: memref<2x5x84x80xbf16, #tpu.memory_space<vmem>>, %arg5: memref<1x80xf32, #tpu.memory_space<vmem>>, %arg6: memref<5x80x120xbf16, #tpu.memory_space<vmem>>, %arg7: memref<1x120xf32, #tpu.memory_space<vmem>>, %arg8: memref<120x84xbf16, #tpu.memory_space<vmem>>, %arg9: memref<1x84xf32, #tpu.memory_space<vmem>>, %arg10: memref<84x10xbf16, #tpu.memory_space<vmem>>, %arg11: memref<1x10xf32, #tpu.memory_space<vmem>>, %arg12: memref<8x10xf32, #tpu.memory_space<vmem>>) attributes {dimension_semantics = [#tpu.dimension_semantics<parallel>], iteration_bounds = array<i64: 1>, scalar_prefetch = 0 : i64, scratch_operands = 0 : i64, tpu.core_type = #tpu.core_type<tc>, window_params = [{transform_indices = @transform_0, window_bounds = array<i64: 32, 8, 96>}, {pipeline_mode = #tpu.pipeline_mode<synchronous>, transform_indices = @transform_1, window_bounds = array<i64: 2, 5, 96, 84>}, {pipeline_mode = #tpu.pipeline_mode<synchronous>, transform_indices = @transform_2, window_bounds = array<i64: 1, 84>}, {pipeline_mode = #tpu.pipeline_mode<synchronous>, transform_indices = @transform_3, window_bounds = array<i64: 2, 5, 84, 80>}, {pipeline_mode = #tpu.pipeline_mode<synchronous>, transform_indices = @transform_4, window_bounds = array<i64: 1, 80>}, {pipeline_mode = #tpu.pipeline_mode<synchronous>, transform_indices = @transform_5, window_bounds = array<i64: 5, 80, 120>}, {pipeline_mode = #tpu.pipeline_mode<synchronous>, transform_indices = @transform_6, window_bounds = array<i64: 1, 120>}, {pipeline_mode = #tpu.pipeline_mode<synchronous>, transform_indices = @transform_7, window_bounds = array<i64: 120, 84>}, {pipeline_mode = #tpu.pipeline_mode<synchronous>, transform_indices = @transform_8, window_bounds = array<i64: 1, 84>}, {pipeline_mode = #tpu.pipeline_mode<synchronous>, transform_indices = @transform_9, window_bounds = array<i64: 84, 10>}, {pipeline_mode = #tpu.pipeline_mode<synchronous>, transform_indices = @transform_10, window_bounds = array<i64: 1, 10>}, {transform_indices = @transform_11, window_bounds = array<i64: 8, 10>}]} {
    %c0 = arith.constant 0 : index
    %c0_0 = arith.constant 0 : index
    %c0_1 = arith.constant 0 : index
    %0 = vector.load %arg1[%c0, %c0_0, %c0_1] : memref<32x8x96xbf16, #tpu.memory_space<vmem>>, vector<32x8x96xbf16>
    %1 = vector.extract_strided_slice %0 {offsets = [0, 0, 0], sizes = [28, 8, 96], strides = [1, 1, 1]} : vector<32x8x96xbf16> to vector<28x8x96xbf16>
    %2 = vector.shape_cast %1 : vector<28x8x96xbf16> to vector<224x96xbf16>
    %c0_2 = arith.constant 0 : index
    %c0_3 = arith.constant 0 : index
    %c0_4 = arith.constant 0 : index
    %c0_5 = arith.constant 0 : index
    %3 = vector.load %arg2[%c0_2, %c0_3, %c0_4, %c0_5] : memref<2x5x96x84xbf16, #tpu.memory_space<vmem>>, vector<1x1x96x84xbf16>
    %4 = vector.shape_cast %3 : vector<1x1x96x84xbf16> to vector<96x84xbf16>
    %cst = arith.constant dense<0.000000e+00> : vector<224x84xf32>
    %5 = tpu.matmul %2, %4, %cst {dimension_numbers = #tpu.dot_dimension_numbers<[1], [0], [0], [1], [0, 0, 1, 1], [], []>} : vector<224x96xbf16>, vector<96x84xbf16>, vector<224x84xf32> -> vector<224x84xf32>
    %6 = vector.extract_strided_slice %0 {offsets = [1, 0, 0], sizes = [28, 8, 96], strides = [1, 1, 1]} : vector<32x8x96xbf16> to vector<28x8x96xbf16>
    %7 = vector.shape_cast %6 : vector<28x8x96xbf16> to vector<224x96xbf16>
    %c0_6 = arith.constant 0 : index
    %c1 = arith.constant 1 : index
    %c0_7 = arith.constant 0 : index
    %c0_8 = arith.constant 0 : index
    %8 = vector.load %arg2[%c0_6, %c1, %c0_7, %c0_8] : memref<2x5x96x84xbf16, #tpu.memory_space<vmem>>, vector<1x1x96x84xbf16>
    %9 = vector.shape_cast %8 : vector<1x1x96x84xbf16> to vector<96x84xbf16>
    %cst_9 = arith.constant dense<0.000000e+00> : vector<224x84xf32>
    %10 = tpu.matmul %7, %9, %cst_9 {dimension_numbers = #tpu.dot_dimension_numbers<[1], [0], [0], [1], [0, 0, 1, 1], [], []>} : vector<224x96xbf16>, vector<96x84xbf16>, vector<224x84xf32> -> vector<224x84xf32>
    %11 = arith.addf %5, %10 : vector<224x84xf32>
    %12 = vector.extract_strided_slice %0 {offsets = [2, 0, 0], sizes = [28, 8, 96], strides = [1, 1, 1]} : vector<32x8x96xbf16> to vector<28x8x96xbf16>
    %13 = vector.shape_cast %12 : vector<28x8x96xbf16> to vector<224x96xbf16>
    %c0_10 = arith.constant 0 : index
    %c2 = arith.constant 2 : index
    %c0_11 = arith.constant 0 : index
    %c0_12 = arith.constant 0 : index
    %14 = vector.load %arg2[%c0_10, %c2, %c0_11, %c0_12] : memref<2x5x96x84xbf16, #tpu.memory_space<vmem>>, vector<1x1x96x84xbf16>
    %15 = vector.shape_cast %14 : vector<1x1x96x84xbf16> to vector<96x84xbf16>
    %cst_13 = arith.constant dense<0.000000e+00> : vector<224x84xf32>
    %16 = tpu.matmul %13, %15, %cst_13 {dimension_numbers = #tpu.dot_dimension_numbers<[1], [0], [0], [1], [0, 0, 1, 1], [], []>} : vector<224x96xbf16>, vector<96x84xbf16>, vector<224x84xf32> -> vector<224x84xf32>
    %17 = arith.addf %11, %16 : vector<224x84xf32>
    %18 = vector.extract_strided_slice %0 {offsets = [3, 0, 0], sizes = [28, 8, 96], strides = [1, 1, 1]} : vector<32x8x96xbf16> to vector<28x8x96xbf16>
    %19 = vector.shape_cast %18 : vector<28x8x96xbf16> to vector<224x96xbf16>
    %c0_14 = arith.constant 0 : index
    %c3 = arith.constant 3 : index
    %c0_15 = arith.constant 0 : index
    %c0_16 = arith.constant 0 : index
    %20 = vector.load %arg2[%c0_14, %c3, %c0_15, %c0_16] : memref<2x5x96x84xbf16, #tpu.memory_space<vmem>>, vector<1x1x96x84xbf16>
    %21 = vector.shape_cast %20 : vector<1x1x96x84xbf16> to vector<96x84xbf16>
    %cst_17 = arith.constant dense<0.000000e+00> : vector<224x84xf32>
    %22 = tpu.matmul %19, %21, %cst_17 {dimension_numbers = #tpu.dot_dimension_numbers<[1], [0], [0], [1], [0, 0, 1, 1], [], []>} : vector<224x96xbf16>, vector<96x84xbf16>, vector<224x84xf32> -> vector<224x84xf32>
    %23 = arith.addf %17, %22 : vector<224x84xf32>
    %24 = vector.extract_strided_slice %0 {offsets = [4, 0, 0], sizes = [28, 8, 96], strides = [1, 1, 1]} : vector<32x8x96xbf16> to vector<28x8x96xbf16>
    %25 = vector.shape_cast %24 : vector<28x8x96xbf16> to vector<224x96xbf16>
    %c0_18 = arith.constant 0 : index
    %c4 = arith.constant 4 : index
    %c0_19 = arith.constant 0 : index
    %c0_20 = arith.constant 0 : index
    %26 = vector.load %arg2[%c0_18, %c4, %c0_19, %c0_20] : memref<2x5x96x84xbf16, #tpu.memory_space<vmem>>, vector<1x1x96x84xbf16>
    %27 = vector.shape_cast %26 : vector<1x1x96x84xbf16> to vector<96x84xbf16>
    %cst_21 = arith.constant dense<0.000000e+00> : vector<224x84xf32>
    %28 = tpu.matmul %25, %27, %cst_21 {dimension_numbers = #tpu.dot_dimension_numbers<[1], [0], [0], [1], [0, 0, 1, 1], [], []>} : vector<224x96xbf16>, vector<96x84xbf16>, vector<224x84xf32> -> vector<224x84xf32>
    %29 = arith.addf %23, %28 : vector<224x84xf32>
    %30 = vector.shape_cast %29 : vector<224x84xf32> to vector<14x16x84xf32>
    %31 = vector.extract_strided_slice %30 {offsets = [0, 0, 0], sizes = [14, 8, 84], strides = [1, 1, 1]} : vector<14x16x84xf32> to vector<14x8x84xf32>
    %32 = vector.extract_strided_slice %30 {offsets = [0, 8, 0], sizes = [14, 8, 84], strides = [1, 1, 1]} : vector<14x16x84xf32> to vector<14x8x84xf32>
    %33 = arith.maximumf %31, %32 : vector<14x8x84xf32>
    %34 = vector.extract_strided_slice %0 {offsets = [0, 0, 0], sizes = [28, 8, 96], strides = [1, 1, 1]} : vector<32x8x96xbf16> to vector<28x8x96xbf16>
    %35 = vector.shape_cast %34 : vector<28x8x96xbf16> to vector<224x96xbf16>
    %c1_22 = arith.constant 1 : index
    %c0_23 = arith.constant 0 : index
    %c0_24 = arith.constant 0 : index
    %c0_25 = arith.constant 0 : index
    %36 = vector.load %arg2[%c1_22, %c0_23, %c0_24, %c0_25] : memref<2x5x96x84xbf16, #tpu.memory_space<vmem>>, vector<1x1x96x84xbf16>
    %37 = vector.shape_cast %36 : vector<1x1x96x84xbf16> to vector<96x84xbf16>
    %cst_26 = arith.constant dense<0.000000e+00> : vector<224x84xf32>
    %38 = tpu.matmul %35, %37, %cst_26 {dimension_numbers = #tpu.dot_dimension_numbers<[1], [0], [0], [1], [0, 0, 1, 1], [], []>} : vector<224x96xbf16>, vector<96x84xbf16>, vector<224x84xf32> -> vector<224x84xf32>
    %39 = vector.extract_strided_slice %0 {offsets = [1, 0, 0], sizes = [28, 8, 96], strides = [1, 1, 1]} : vector<32x8x96xbf16> to vector<28x8x96xbf16>
    %40 = vector.shape_cast %39 : vector<28x8x96xbf16> to vector<224x96xbf16>
    %c1_27 = arith.constant 1 : index
    %c1_28 = arith.constant 1 : index
    %c0_29 = arith.constant 0 : index
    %c0_30 = arith.constant 0 : index
    %41 = vector.load %arg2[%c1_27, %c1_28, %c0_29, %c0_30] : memref<2x5x96x84xbf16, #tpu.memory_space<vmem>>, vector<1x1x96x84xbf16>
    %42 = vector.shape_cast %41 : vector<1x1x96x84xbf16> to vector<96x84xbf16>
    %cst_31 = arith.constant dense<0.000000e+00> : vector<224x84xf32>
    %43 = tpu.matmul %40, %42, %cst_31 {dimension_numbers = #tpu.dot_dimension_numbers<[1], [0], [0], [1], [0, 0, 1, 1], [], []>} : vector<224x96xbf16>, vector<96x84xbf16>, vector<224x84xf32> -> vector<224x84xf32>
    %44 = arith.addf %38, %43 : vector<224x84xf32>
    %45 = vector.extract_strided_slice %0 {offsets = [2, 0, 0], sizes = [28, 8, 96], strides = [1, 1, 1]} : vector<32x8x96xbf16> to vector<28x8x96xbf16>
    %46 = vector.shape_cast %45 : vector<28x8x96xbf16> to vector<224x96xbf16>
    %c1_32 = arith.constant 1 : index
    %c2_33 = arith.constant 2 : index
    %c0_34 = arith.constant 0 : index
    %c0_35 = arith.constant 0 : index
    %47 = vector.load %arg2[%c1_32, %c2_33, %c0_34, %c0_35] : memref<2x5x96x84xbf16, #tpu.memory_space<vmem>>, vector<1x1x96x84xbf16>
    %48 = vector.shape_cast %47 : vector<1x1x96x84xbf16> to vector<96x84xbf16>
    %cst_36 = arith.constant dense<0.000000e+00> : vector<224x84xf32>
    %49 = tpu.matmul %46, %48, %cst_36 {dimension_numbers = #tpu.dot_dimension_numbers<[1], [0], [0], [1], [0, 0, 1, 1], [], []>} : vector<224x96xbf16>, vector<96x84xbf16>, vector<224x84xf32> -> vector<224x84xf32>
    %50 = arith.addf %44, %49 : vector<224x84xf32>
    %51 = vector.extract_strided_slice %0 {offsets = [3, 0, 0], sizes = [28, 8, 96], strides = [1, 1, 1]} : vector<32x8x96xbf16> to vector<28x8x96xbf16>
    %52 = vector.shape_cast %51 : vector<28x8x96xbf16> to vector<224x96xbf16>
    %c1_37 = arith.constant 1 : index
    %c3_38 = arith.constant 3 : index
    %c0_39 = arith.constant 0 : index
    %c0_40 = arith.constant 0 : index
    %53 = vector.load %arg2[%c1_37, %c3_38, %c0_39, %c0_40] : memref<2x5x96x84xbf16, #tpu.memory_space<vmem>>, vector<1x1x96x84xbf16>
    %54 = vector.shape_cast %53 : vector<1x1x96x84xbf16> to vector<96x84xbf16>
    %cst_41 = arith.constant dense<0.000000e+00> : vector<224x84xf32>
    %55 = tpu.matmul %52, %54, %cst_41 {dimension_numbers = #tpu.dot_dimension_numbers<[1], [0], [0], [1], [0, 0, 1, 1], [], []>} : vector<224x96xbf16>, vector<96x84xbf16>, vector<224x84xf32> -> vector<224x84xf32>
    %56 = arith.addf %50, %55 : vector<224x84xf32>
    %57 = vector.extract_strided_slice %0 {offsets = [4, 0, 0], sizes = [28, 8, 96], strides = [1, 1, 1]} : vector<32x8x96xbf16> to vector<28x8x96xbf16>
    %58 = vector.shape_cast %57 : vector<28x8x96xbf16> to vector<224x96xbf16>
    %c1_42 = arith.constant 1 : index
    %c4_43 = arith.constant 4 : index
    %c0_44 = arith.constant 0 : index
    %c0_45 = arith.constant 0 : index
    %59 = vector.load %arg2[%c1_42, %c4_43, %c0_44, %c0_45] : memref<2x5x96x84xbf16, #tpu.memory_space<vmem>>, vector<1x1x96x84xbf16>
    %60 = vector.shape_cast %59 : vector<1x1x96x84xbf16> to vector<96x84xbf16>
    %cst_46 = arith.constant dense<0.000000e+00> : vector<224x84xf32>
    %61 = tpu.matmul %58, %60, %cst_46 {dimension_numbers = #tpu.dot_dimension_numbers<[1], [0], [0], [1], [0, 0, 1, 1], [], []>} : vector<224x96xbf16>, vector<96x84xbf16>, vector<224x84xf32> -> vector<224x84xf32>
    %62 = arith.addf %56, %61 : vector<224x84xf32>
    %63 = vector.shape_cast %62 : vector<224x84xf32> to vector<14x16x84xf32>
    %64 = vector.extract_strided_slice %63 {offsets = [0, 0, 0], sizes = [14, 8, 84], strides = [1, 1, 1]} : vector<14x16x84xf32> to vector<14x8x84xf32>
    %65 = vector.extract_strided_slice %63 {offsets = [0, 8, 0], sizes = [14, 8, 84], strides = [1, 1, 1]} : vector<14x16x84xf32> to vector<14x8x84xf32>
    %66 = arith.maximumf %64, %65 : vector<14x8x84xf32>
    %67 = arith.maximumf %33, %66 : vector<14x8x84xf32>
    %c0_47 = arith.constant 0 : index
    %c0_48 = arith.constant 0 : index
    %68 = vector.load %arg3[%c0_47, %c0_48] : memref<1x84xf32, #tpu.memory_space<vmem>>, vector<1x84xf32>
    %69 = vector.shape_cast %68 : vector<1x84xf32> to vector<1x1x84xf32>
    %70 = vector.broadcast %69 : vector<1x1x84xf32> to vector<14x8x84xf32>
    %71 = arith.addf %67, %70 : vector<14x8x84xf32>
    %cst_49 = arith.constant 0.000000e+00 : f32
    %72 = vector.broadcast %cst_49 : f32 to vector<14x8x84xf32>
    %73 = arith.maximumf %71, %72 : vector<14x8x84xf32>
    %74 = arith.truncf %73 : vector<14x8x84xf32> to vector<14x8x84xbf16>
    %75 = vector.extract_strided_slice %74 {offsets = [0, 0, 0], sizes = [10, 8, 84], strides = [1, 1, 1]} : vector<14x8x84xbf16> to vector<10x8x84xbf16>
    %76 = vector.shape_cast %75 : vector<10x8x84xbf16> to vector<80x84xbf16>
    %c0_50 = arith.constant 0 : index
    %c0_51 = arith.constant 0 : index
    %c0_52 = arith.constant 0 : index
    %c0_53 = arith.constant 0 : index
    %77 = vector.load %arg4[%c0_50, %c0_51, %c0_52, %c0_53] : memref<2x5x84x80xbf16, #tpu.memory_space<vmem>>, vector<1x1x84x80xbf16>
    %78 = vector.shape_cast %77 : vector<1x1x84x80xbf16> to vector<84x80xbf16>
    %cst_54 = arith.constant dense<0.000000e+00> : vector<80x80xf32>
    %79 = tpu.matmul %76, %78, %cst_54 {dimension_numbers = #tpu.dot_dimension_numbers<[1], [0], [0], [1], [0, 0, 1, 1], [], []>} : vector<80x84xbf16>, vector<84x80xbf16>, vector<80x80xf32> -> vector<80x80xf32>
    %80 = vector.extract_strided_slice %74 {offsets = [1, 0, 0], sizes = [10, 8, 84], strides = [1, 1, 1]} : vector<14x8x84xbf16> to vector<10x8x84xbf16>
    %81 = vector.shape_cast %80 : vector<10x8x84xbf16> to vector<80x84xbf16>
    %c0_55 = arith.constant 0 : index
    %c1_56 = arith.constant 1 : index
    %c0_57 = arith.constant 0 : index
    %c0_58 = arith.constant 0 : index
    %82 = vector.load %arg4[%c0_55, %c1_56, %c0_57, %c0_58] : memref<2x5x84x80xbf16, #tpu.memory_space<vmem>>, vector<1x1x84x80xbf16>
    %83 = vector.shape_cast %82 : vector<1x1x84x80xbf16> to vector<84x80xbf16>
    %cst_59 = arith.constant dense<0.000000e+00> : vector<80x80xf32>
    %84 = tpu.matmul %81, %83, %cst_59 {dimension_numbers = #tpu.dot_dimension_numbers<[1], [0], [0], [1], [0, 0, 1, 1], [], []>} : vector<80x84xbf16>, vector<84x80xbf16>, vector<80x80xf32> -> vector<80x80xf32>
    %85 = arith.addf %79, %84 : vector<80x80xf32>
    %86 = vector.extract_strided_slice %74 {offsets = [2, 0, 0], sizes = [10, 8, 84], strides = [1, 1, 1]} : vector<14x8x84xbf16> to vector<10x8x84xbf16>
    %87 = vector.shape_cast %86 : vector<10x8x84xbf16> to vector<80x84xbf16>
    %c0_60 = arith.constant 0 : index
    %c2_61 = arith.constant 2 : index
    %c0_62 = arith.constant 0 : index
    %c0_63 = arith.constant 0 : index
    %88 = vector.load %arg4[%c0_60, %c2_61, %c0_62, %c0_63] : memref<2x5x84x80xbf16, #tpu.memory_space<vmem>>, vector<1x1x84x80xbf16>
    %89 = vector.shape_cast %88 : vector<1x1x84x80xbf16> to vector<84x80xbf16>
    %cst_64 = arith.constant dense<0.000000e+00> : vector<80x80xf32>
    %90 = tpu.matmul %87, %89, %cst_64 {dimension_numbers = #tpu.dot_dimension_numbers<[1], [0], [0], [1], [0, 0, 1, 1], [], []>} : vector<80x84xbf16>, vector<84x80xbf16>, vector<80x80xf32> -> vector<80x80xf32>
    %91 = arith.addf %85, %90 : vector<80x80xf32>
    %92 = vector.extract_strided_slice %74 {offsets = [3, 0, 0], sizes = [10, 8, 84], strides = [1, 1, 1]} : vector<14x8x84xbf16> to vector<10x8x84xbf16>
    %93 = vector.shape_cast %92 : vector<10x8x84xbf16> to vector<80x84xbf16>
    %c0_65 = arith.constant 0 : index
    %c3_66 = arith.constant 3 : index
    %c0_67 = arith.constant 0 : index
    %c0_68 = arith.constant 0 : index
    %94 = vector.load %arg4[%c0_65, %c3_66, %c0_67, %c0_68] : memref<2x5x84x80xbf16, #tpu.memory_space<vmem>>, vector<1x1x84x80xbf16>
    %95 = vector.shape_cast %94 : vector<1x1x84x80xbf16> to vector<84x80xbf16>
    %cst_69 = arith.constant dense<0.000000e+00> : vector<80x80xf32>
    %96 = tpu.matmul %93, %95, %cst_69 {dimension_numbers = #tpu.dot_dimension_numbers<[1], [0], [0], [1], [0, 0, 1, 1], [], []>} : vector<80x84xbf16>, vector<84x80xbf16>, vector<80x80xf32> -> vector<80x80xf32>
    %97 = arith.addf %91, %96 : vector<80x80xf32>
    %98 = vector.extract_strided_slice %74 {offsets = [4, 0, 0], sizes = [10, 8, 84], strides = [1, 1, 1]} : vector<14x8x84xbf16> to vector<10x8x84xbf16>
    %99 = vector.shape_cast %98 : vector<10x8x84xbf16> to vector<80x84xbf16>
    %c0_70 = arith.constant 0 : index
    %c4_71 = arith.constant 4 : index
    %c0_72 = arith.constant 0 : index
    %c0_73 = arith.constant 0 : index
    %100 = vector.load %arg4[%c0_70, %c4_71, %c0_72, %c0_73] : memref<2x5x84x80xbf16, #tpu.memory_space<vmem>>, vector<1x1x84x80xbf16>
    %101 = vector.shape_cast %100 : vector<1x1x84x80xbf16> to vector<84x80xbf16>
    %cst_74 = arith.constant dense<0.000000e+00> : vector<80x80xf32>
    %102 = tpu.matmul %99, %101, %cst_74 {dimension_numbers = #tpu.dot_dimension_numbers<[1], [0], [0], [1], [0, 0, 1, 1], [], []>} : vector<80x84xbf16>, vector<84x80xbf16>, vector<80x80xf32> -> vector<80x80xf32>
    %103 = arith.addf %97, %102 : vector<80x80xf32>
    %104 = vector.shape_cast %103 : vector<80x80xf32> to vector<5x16x80xf32>
    %105 = vector.extract_strided_slice %104 {offsets = [0, 0, 0], sizes = [5, 8, 80], strides = [1, 1, 1]} : vector<5x16x80xf32> to vector<5x8x80xf32>
    %106 = vector.extract_strided_slice %104 {offsets = [0, 8, 0], sizes = [5, 8, 80], strides = [1, 1, 1]} : vector<5x16x80xf32> to vector<5x8x80xf32>
    %107 = arith.maximumf %105, %106 : vector<5x8x80xf32>
    %108 = vector.extract_strided_slice %74 {offsets = [0, 0, 0], sizes = [10, 8, 84], strides = [1, 1, 1]} : vector<14x8x84xbf16> to vector<10x8x84xbf16>
    %109 = vector.shape_cast %108 : vector<10x8x84xbf16> to vector<80x84xbf16>
    %c1_75 = arith.constant 1 : index
    %c0_76 = arith.constant 0 : index
    %c0_77 = arith.constant 0 : index
    %c0_78 = arith.constant 0 : index
    %110 = vector.load %arg4[%c1_75, %c0_76, %c0_77, %c0_78] : memref<2x5x84x80xbf16, #tpu.memory_space<vmem>>, vector<1x1x84x80xbf16>
    %111 = vector.shape_cast %110 : vector<1x1x84x80xbf16> to vector<84x80xbf16>
    %cst_79 = arith.constant dense<0.000000e+00> : vector<80x80xf32>
    %112 = tpu.matmul %109, %111, %cst_79 {dimension_numbers = #tpu.dot_dimension_numbers<[1], [0], [0], [1], [0, 0, 1, 1], [], []>} : vector<80x84xbf16>, vector<84x80xbf16>, vector<80x80xf32> -> vector<80x80xf32>
    %113 = vector.extract_strided_slice %74 {offsets = [1, 0, 0], sizes = [10, 8, 84], strides = [1, 1, 1]} : vector<14x8x84xbf16> to vector<10x8x84xbf16>
    %114 = vector.shape_cast %113 : vector<10x8x84xbf16> to vector<80x84xbf16>
    %c1_80 = arith.constant 1 : index
    %c1_81 = arith.constant 1 : index
    %c0_82 = arith.constant 0 : index
    %c0_83 = arith.constant 0 : index
    %115 = vector.load %arg4[%c1_80, %c1_81, %c0_82, %c0_83] : memref<2x5x84x80xbf16, #tpu.memory_space<vmem>>, vector<1x1x84x80xbf16>
    %116 = vector.shape_cast %115 : vector<1x1x84x80xbf16> to vector<84x80xbf16>
    %cst_84 = arith.constant dense<0.000000e+00> : vector<80x80xf32>
    %117 = tpu.matmul %114, %116, %cst_84 {dimension_numbers = #tpu.dot_dimension_numbers<[1], [0], [0], [1], [0, 0, 1, 1], [], []>} : vector<80x84xbf16>, vector<84x80xbf16>, vector<80x80xf32> -> vector<80x80xf32>
    %118 = arith.addf %112, %117 : vector<80x80xf32>
    %119 = vector.extract_strided_slice %74 {offsets = [2, 0, 0], sizes = [10, 8, 84], strides = [1, 1, 1]} : vector<14x8x84xbf16> to vector<10x8x84xbf16>
    %120 = vector.shape_cast %119 : vector<10x8x84xbf16> to vector<80x84xbf16>
    %c1_85 = arith.constant 1 : index
    %c2_86 = arith.constant 2 : index
    %c0_87 = arith.constant 0 : index
    %c0_88 = arith.constant 0 : index
    %121 = vector.load %arg4[%c1_85, %c2_86, %c0_87, %c0_88] : memref<2x5x84x80xbf16, #tpu.memory_space<vmem>>, vector<1x1x84x80xbf16>
    %122 = vector.shape_cast %121 : vector<1x1x84x80xbf16> to vector<84x80xbf16>
    %cst_89 = arith.constant dense<0.000000e+00> : vector<80x80xf32>
    %123 = tpu.matmul %120, %122, %cst_89 {dimension_numbers = #tpu.dot_dimension_numbers<[1], [0], [0], [1], [0, 0, 1, 1], [], []>} : vector<80x84xbf16>, vector<84x80xbf16>, vector<80x80xf32> -> vector<80x80xf32>
    %124 = arith.addf %118, %123 : vector<80x80xf32>
    %125 = vector.extract_strided_slice %74 {offsets = [3, 0, 0], sizes = [10, 8, 84], strides = [1, 1, 1]} : vector<14x8x84xbf16> to vector<10x8x84xbf16>
    %126 = vector.shape_cast %125 : vector<10x8x84xbf16> to vector<80x84xbf16>
    %c1_90 = arith.constant 1 : index
    %c3_91 = arith.constant 3 : index
    %c0_92 = arith.constant 0 : index
    %c0_93 = arith.constant 0 : index
    %127 = vector.load %arg4[%c1_90, %c3_91, %c0_92, %c0_93] : memref<2x5x84x80xbf16, #tpu.memory_space<vmem>>, vector<1x1x84x80xbf16>
    %128 = vector.shape_cast %127 : vector<1x1x84x80xbf16> to vector<84x80xbf16>
    %cst_94 = arith.constant dense<0.000000e+00> : vector<80x80xf32>
    %129 = tpu.matmul %126, %128, %cst_94 {dimension_numbers = #tpu.dot_dimension_numbers<[1], [0], [0], [1], [0, 0, 1, 1], [], []>} : vector<80x84xbf16>, vector<84x80xbf16>, vector<80x80xf32> -> vector<80x80xf32>
    %130 = arith.addf %124, %129 : vector<80x80xf32>
    %131 = vector.extract_strided_slice %74 {offsets = [4, 0, 0], sizes = [10, 8, 84], strides = [1, 1, 1]} : vector<14x8x84xbf16> to vector<10x8x84xbf16>
    %132 = vector.shape_cast %131 : vector<10x8x84xbf16> to vector<80x84xbf16>
    %c1_95 = arith.constant 1 : index
    %c4_96 = arith.constant 4 : index
    %c0_97 = arith.constant 0 : index
    %c0_98 = arith.constant 0 : index
    %133 = vector.load %arg4[%c1_95, %c4_96, %c0_97, %c0_98] : memref<2x5x84x80xbf16, #tpu.memory_space<vmem>>, vector<1x1x84x80xbf16>
    %134 = vector.shape_cast %133 : vector<1x1x84x80xbf16> to vector<84x80xbf16>
    %cst_99 = arith.constant dense<0.000000e+00> : vector<80x80xf32>
    %135 = tpu.matmul %132, %134, %cst_99 {dimension_numbers = #tpu.dot_dimension_numbers<[1], [0], [0], [1], [0, 0, 1, 1], [], []>} : vector<80x84xbf16>, vector<84x80xbf16>, vector<80x80xf32> -> vector<80x80xf32>
    %136 = arith.addf %130, %135 : vector<80x80xf32>
    %137 = vector.shape_cast %136 : vector<80x80xf32> to vector<5x16x80xf32>
    %138 = vector.extract_strided_slice %137 {offsets = [0, 0, 0], sizes = [5, 8, 80], strides = [1, 1, 1]} : vector<5x16x80xf32> to vector<5x8x80xf32>
    %139 = vector.extract_strided_slice %137 {offsets = [0, 8, 0], sizes = [5, 8, 80], strides = [1, 1, 1]} : vector<5x16x80xf32> to vector<5x8x80xf32>
    %140 = arith.maximumf %138, %139 : vector<5x8x80xf32>
    %141 = arith.maximumf %107, %140 : vector<5x8x80xf32>
    %c0_100 = arith.constant 0 : index
    %c0_101 = arith.constant 0 : index
    %142 = vector.load %arg5[%c0_100, %c0_101] : memref<1x80xf32, #tpu.memory_space<vmem>>, vector<1x80xf32>
    %143 = vector.shape_cast %142 : vector<1x80xf32> to vector<1x1x80xf32>
    %144 = vector.broadcast %143 : vector<1x1x80xf32> to vector<5x8x80xf32>
    %145 = arith.addf %141, %144 : vector<5x8x80xf32>
    %cst_102 = arith.constant 0.000000e+00 : f32
    %146 = vector.broadcast %cst_102 : f32 to vector<5x8x80xf32>
    %147 = arith.maximumf %145, %146 : vector<5x8x80xf32>
    %148 = arith.truncf %147 : vector<5x8x80xf32> to vector<5x8x80xbf16>
    %149 = vector.extract_strided_slice %148 {offsets = [0, 0, 0], sizes = [1, 8, 80], strides = [1, 1, 1]} : vector<5x8x80xbf16> to vector<1x8x80xbf16>
    %150 = vector.shape_cast %149 : vector<1x8x80xbf16> to vector<8x80xbf16>
    %c0_103 = arith.constant 0 : index
    %c0_104 = arith.constant 0 : index
    %c0_105 = arith.constant 0 : index
    %151 = vector.load %arg6[%c0_103, %c0_104, %c0_105] : memref<5x80x120xbf16, #tpu.memory_space<vmem>>, vector<1x80x120xbf16>
    %152 = vector.shape_cast %151 : vector<1x80x120xbf16> to vector<80x120xbf16>
    %cst_106 = arith.constant dense<0.000000e+00> : vector<8x120xf32>
    %153 = tpu.matmul %150, %152, %cst_106 {dimension_numbers = #tpu.dot_dimension_numbers<[1], [0], [0], [1], [0, 0, 1, 1], [], []>} : vector<8x80xbf16>, vector<80x120xbf16>, vector<8x120xf32> -> vector<8x120xf32>
    %154 = vector.extract_strided_slice %148 {offsets = [1, 0, 0], sizes = [1, 8, 80], strides = [1, 1, 1]} : vector<5x8x80xbf16> to vector<1x8x80xbf16>
    %155 = vector.shape_cast %154 : vector<1x8x80xbf16> to vector<8x80xbf16>
    %c1_107 = arith.constant 1 : index
    %c0_108 = arith.constant 0 : index
    %c0_109 = arith.constant 0 : index
    %156 = vector.load %arg6[%c1_107, %c0_108, %c0_109] : memref<5x80x120xbf16, #tpu.memory_space<vmem>>, vector<1x80x120xbf16>
    %157 = vector.shape_cast %156 : vector<1x80x120xbf16> to vector<80x120xbf16>
    %cst_110 = arith.constant dense<0.000000e+00> : vector<8x120xf32>
    %158 = tpu.matmul %155, %157, %cst_110 {dimension_numbers = #tpu.dot_dimension_numbers<[1], [0], [0], [1], [0, 0, 1, 1], [], []>} : vector<8x80xbf16>, vector<80x120xbf16>, vector<8x120xf32> -> vector<8x120xf32>
    %159 = arith.addf %153, %158 : vector<8x120xf32>
    %160 = vector.extract_strided_slice %148 {offsets = [2, 0, 0], sizes = [1, 8, 80], strides = [1, 1, 1]} : vector<5x8x80xbf16> to vector<1x8x80xbf16>
    %161 = vector.shape_cast %160 : vector<1x8x80xbf16> to vector<8x80xbf16>
    %c2_111 = arith.constant 2 : index
    %c0_112 = arith.constant 0 : index
    %c0_113 = arith.constant 0 : index
    %162 = vector.load %arg6[%c2_111, %c0_112, %c0_113] : memref<5x80x120xbf16, #tpu.memory_space<vmem>>, vector<1x80x120xbf16>
    %163 = vector.shape_cast %162 : vector<1x80x120xbf16> to vector<80x120xbf16>
    %cst_114 = arith.constant dense<0.000000e+00> : vector<8x120xf32>
    %164 = tpu.matmul %161, %163, %cst_114 {dimension_numbers = #tpu.dot_dimension_numbers<[1], [0], [0], [1], [0, 0, 1, 1], [], []>} : vector<8x80xbf16>, vector<80x120xbf16>, vector<8x120xf32> -> vector<8x120xf32>
    %165 = arith.addf %159, %164 : vector<8x120xf32>
    %166 = vector.extract_strided_slice %148 {offsets = [3, 0, 0], sizes = [1, 8, 80], strides = [1, 1, 1]} : vector<5x8x80xbf16> to vector<1x8x80xbf16>
    %167 = vector.shape_cast %166 : vector<1x8x80xbf16> to vector<8x80xbf16>
    %c3_115 = arith.constant 3 : index
    %c0_116 = arith.constant 0 : index
    %c0_117 = arith.constant 0 : index
    %168 = vector.load %arg6[%c3_115, %c0_116, %c0_117] : memref<5x80x120xbf16, #tpu.memory_space<vmem>>, vector<1x80x120xbf16>
    %169 = vector.shape_cast %168 : vector<1x80x120xbf16> to vector<80x120xbf16>
    %cst_118 = arith.constant dense<0.000000e+00> : vector<8x120xf32>
    %170 = tpu.matmul %167, %169, %cst_118 {dimension_numbers = #tpu.dot_dimension_numbers<[1], [0], [0], [1], [0, 0, 1, 1], [], []>} : vector<8x80xbf16>, vector<80x120xbf16>, vector<8x120xf32> -> vector<8x120xf32>
    %171 = arith.addf %165, %170 : vector<8x120xf32>
    %172 = vector.extract_strided_slice %148 {offsets = [4, 0, 0], sizes = [1, 8, 80], strides = [1, 1, 1]} : vector<5x8x80xbf16> to vector<1x8x80xbf16>
    %173 = vector.shape_cast %172 : vector<1x8x80xbf16> to vector<8x80xbf16>
    %c4_119 = arith.constant 4 : index
    %c0_120 = arith.constant 0 : index
    %c0_121 = arith.constant 0 : index
    %174 = vector.load %arg6[%c4_119, %c0_120, %c0_121] : memref<5x80x120xbf16, #tpu.memory_space<vmem>>, vector<1x80x120xbf16>
    %175 = vector.shape_cast %174 : vector<1x80x120xbf16> to vector<80x120xbf16>
    %cst_122 = arith.constant dense<0.000000e+00> : vector<8x120xf32>
    %176 = tpu.matmul %173, %175, %cst_122 {dimension_numbers = #tpu.dot_dimension_numbers<[1], [0], [0], [1], [0, 0, 1, 1], [], []>} : vector<8x80xbf16>, vector<80x120xbf16>, vector<8x120xf32> -> vector<8x120xf32>
    %177 = arith.addf %171, %176 : vector<8x120xf32>
    %c0_123 = arith.constant 0 : index
    %c0_124 = arith.constant 0 : index
    %178 = vector.load %arg7[%c0_123, %c0_124] : memref<1x120xf32, #tpu.memory_space<vmem>>, vector<1x120xf32>
    %179 = vector.broadcast %178 : vector<1x120xf32> to vector<8x120xf32>
    %180 = arith.addf %177, %179 : vector<8x120xf32>
    %cst_125 = arith.constant 0.000000e+00 : f32
    %181 = vector.broadcast %cst_125 : f32 to vector<8x120xf32>
    %182 = arith.maximumf %180, %181 : vector<8x120xf32>
    %183 = arith.truncf %182 : vector<8x120xf32> to vector<8x120xbf16>
    %c0_126 = arith.constant 0 : index
    %c0_127 = arith.constant 0 : index
    %184 = vector.load %arg8[%c0_126, %c0_127] : memref<120x84xbf16, #tpu.memory_space<vmem>>, vector<120x84xbf16>
    %cst_128 = arith.constant dense<0.000000e+00> : vector<8x84xf32>
    %185 = tpu.matmul %183, %184, %cst_128 {dimension_numbers = #tpu.dot_dimension_numbers<[1], [0], [0], [1], [0, 0, 1, 1], [], []>} : vector<8x120xbf16>, vector<120x84xbf16>, vector<8x84xf32> -> vector<8x84xf32>
    %c0_129 = arith.constant 0 : index
    %c0_130 = arith.constant 0 : index
    %186 = vector.load %arg9[%c0_129, %c0_130] : memref<1x84xf32, #tpu.memory_space<vmem>>, vector<1x84xf32>
    %187 = vector.broadcast %186 : vector<1x84xf32> to vector<8x84xf32>
    %188 = arith.addf %185, %187 : vector<8x84xf32>
    %cst_131 = arith.constant 0.000000e+00 : f32
    %189 = vector.broadcast %cst_131 : f32 to vector<8x84xf32>
    %190 = arith.maximumf %188, %189 : vector<8x84xf32>
    %191 = arith.truncf %190 : vector<8x84xf32> to vector<8x84xbf16>
    %c0_132 = arith.constant 0 : index
    %c0_133 = arith.constant 0 : index
    %192 = vector.load %arg10[%c0_132, %c0_133] : memref<84x10xbf16, #tpu.memory_space<vmem>>, vector<84x10xbf16>
    %cst_134 = arith.constant dense<0.000000e+00> : vector<8x10xf32>
    %193 = tpu.matmul %191, %192, %cst_134 {dimension_numbers = #tpu.dot_dimension_numbers<[1], [0], [0], [1], [0, 0, 1, 1], [], []>} : vector<8x84xbf16>, vector<84x10xbf16>, vector<8x10xf32> -> vector<8x10xf32>
    %c0_135 = arith.constant 0 : index
    %c0_136 = arith.constant 0 : index
    %194 = vector.load %arg11[%c0_135, %c0_136] : memref<1x10xf32, #tpu.memory_space<vmem>>, vector<1x10xf32>
    %195 = vector.broadcast %194 : vector<1x10xf32> to vector<8x10xf32>
    %196 = arith.addf %193, %195 : vector<8x10xf32>
    %c0_137 = arith.constant 0 : index
    %c0_138 = arith.constant 0 : index
    %197 = vector.load %arg12[%c0_137, %c0_138] : memref<8x10xf32, #tpu.memory_space<vmem>>, vector<8x10xf32>
    tpu.vector_store %arg12[%c0_137, %c0_138], %196 {strides = array<i32>} : memref<8x10xf32, #tpu.memory_space<vmem>>, vector<8x10xf32>,
    return
  }
  func.func @transform_0(%arg0: i32) -> (i32, i32, i32) {
    %c0_i32 = arith.constant 0 : i32
    %c0_i32_0 = arith.constant 0 : i32
    %c0_i32_1 = arith.constant 0 : i32
    return %c0_i32, %arg0, %c0_i32_0 : i32, i32, i32
  }
  func.func @transform_1(%arg0: i32) -> (i32, i32, i32, i32) {
    %c0_i32 = arith.constant 0 : i32
    %c0_i32_0 = arith.constant 0 : i32
    %c0_i32_1 = arith.constant 0 : i32
    %c0_i32_2 = arith.constant 0 : i32
    %c0_i32_3 = arith.constant 0 : i32
    return %c0_i32, %c0_i32_0, %c0_i32_1, %c0_i32_2 : i32, i32, i32, i32
  }
  func.func @transform_2(%arg0: i32) -> (i32, i32) {
    %c0_i32 = arith.constant 0 : i32
    %c0_i32_0 = arith.constant 0 : i32
    %c0_i32_1 = arith.constant 0 : i32
    return %c0_i32, %c0_i32_0 : i32, i32
  }
  func.func @transform_3(%arg0: i32) -> (i32, i32, i32, i32) {
    %c0_i32 = arith.constant 0 : i32
    %c0_i32_0 = arith.constant 0 : i32
    %c0_i32_1 = arith.constant 0 : i32
    %c0_i32_2 = arith.constant 0 : i32
    %c0_i32_3 = arith.constant 0 : i32
    return %c0_i32, %c0_i32_0, %c0_i32_1, %c0_i32_2 : i32, i32, i32, i32
  }
  func.func @transform_4(%arg0: i32) -> (i32, i32) {
    %c0_i32 = arith.constant 0 : i32
    %c0_i32_0 = arith.constant 0 : i32
    %c0_i32_1 = arith.constant 0 : i32
    return %c0_i32, %c0_i32_0 : i32, i32
  }
  func.func @transform_5(%arg0: i32) -> (i32, i32, i32) {
    %c0_i32 = arith.constant 0 : i32
    %c0_i32_0 = arith.constant 0 : i32
    %c0_i32_1 = arith.constant 0 : i32
    %c0_i32_2 = arith.constant 0 : i32
    return %c0_i32, %c0_i32_0, %c0_i32_1 : i32, i32, i32
  }
  func.func @transform_6(%arg0: i32) -> (i32, i32) {
    %c0_i32 = arith.constant 0 : i32
    %c0_i32_0 = arith.constant 0 : i32
    %c0_i32_1 = arith.constant 0 : i32
    return %c0_i32, %c0_i32_0 : i32, i32
  }
  func.func @transform_7(%arg0: i32) -> (i32, i32) {
    %c0_i32 = arith.constant 0 : i32
    %c0_i32_0 = arith.constant 0 : i32
    %c0_i32_1 = arith.constant 0 : i32
    return %c0_i32, %c0_i32_0 : i32, i32
  }
  func.func @transform_8(%arg0: i32) -> (i32, i32) {
    %c0_i32 = arith.constant 0 : i32
    %c0_i32_0 = arith.constant 0 : i32
    %c0_i32_1 = arith.constant 0 : i32
    return %c0_i32, %c0_i32_0 : i32, i32
  }
  func.func @transform_9(%arg0: i32) -> (i32, i32) {
    %c0_i32 = arith.constant 0 : i32
    %c0_i32_0 = arith.constant 0 : i32
    %c0_i32_1 = arith.constant 0 : i32
    return %c0_i32, %c0_i32_0 : i32, i32
  }
  func.func @transform_10(%arg0: i32) -> (i32, i32) {
    %c0_i32 = arith.constant 0 : i32
    %c0_i32_0 = arith.constant 0 : i32
    %c0_i32_1 = arith.constant 0 : i32
    return %c0_i32, %c0_i32_0 : i32, i32
  }
  func.func @transform_11(%arg0: i32) -> (i32, i32) {
    %c0_i32 = arith.constant 0 : i32
    %c0_i32_0 = arith.constant 0 : i32
    return %arg0, %c0_i32 : i32, i32
  }
}

</mosaic_0001>

<bundles_post_ra>
// kernel: net_forward.1
= control target key start
LH: loop header
LB: loop body
LE: loop exit
PB: predicated region body
PF: predicated region fallthrough
CT: control target
= control target key end

     0   :  { %vm202_vm0 = vcmask 785408   ;;  %vm2555_vm1 = vcmask 1041408   ;;  %vm6923_vm2 = vmmov 0   ;;  %vm2539_vm3 = vcmask 687104   ;;  %s8392_s1 = inlined_call_operand.vmem [shape: bf16[2,5,96,84], index: 1, kind: input, shape index: {}]   ;;  %s8393_s0 = inlined_call_operand.vmem [shape: bf16[32,8,96], index: 0, kind: input, shape index: {}]   ;;  %s8394_s3 = inlined_call_operand.vmem [shape: bf16[2,5,84,80], index: 3, kind: input, shape index: {}]   ;;  %s8395_s2 = inlined_call_operand.vmem [shape: f32[1,84], index: 2, kind: input, shape index: {}]   ;;  %s8396_s5 = inlined_call_operand.vmem [shape: bf16[5,80,120], index: 5, kind: input, shape index: {}]   ;;  %s8397_s4 = inlined_call_operand.vmem [shape: f32[1,80], index: 4, kind: input, shape index: {}]   ;;  %s8398_s7 = inlined_call_operand.vmem [shape: bf16[120,84], index: 7, kind: input, shape index: {}]   ;;  %s8399_s9 = inlined_call_operand.vmem [shape: bf16[84,10], index: 9, kind: input, shape index: {}]   ;;  %s8400_s6 = inlined_call_operand.vmem [shape: f32[1,120], index: 6, kind: input, shape index: {}]   ;;  %s8401_s8 = inlined_call_operand.vmem [shape: f32[1,84], index: 8, kind: input, shape index: {}]   ;;  %s8402_s10 = inlined_call_operand.vmem [shape: f32[1,10], index: 10, kind: input, shape index: {}]   ;;  %s8403_s11 = inlined_call_operand.vmem [shape: f32[8,10], index: 11, kind: output, shape index: {}]  }
   0x1   :  { %v6732_v0 = vld [vmem:[%s8392_s1 + $0x30] sm:$0xff]   ;;  %v6733_v1 = vld [vmem:[%s8392_s1 + $0x120] sm:$0xff]   ;;  %v6734_v2 = vld [vmem:[%s8392_s1 + $0x38] sm:$0xff]   ;;  %vm3897_vm4 = vcmask 654336   ;;  %vm4350_vm5 = vcmask 1043456   ;;  %vm4346_vm6 = vcmask 982016  }
   0x2   :  { %5520 = vmatprep.subr.bf16.mxu0 %v6732_v0  ;;  %5720 = vmatprep.subr.bf16.mxu1 %v6733_v1  ;;  %v6735_v3 = vld [vmem:[%s8392_s1 + $0x128] sm:$0xff]   ;;  %v6736_v4 = vld [vmem:[%s8392_s1 + $0x40] sm:$0xff]   ;;  %v6737_v5 = vld [vmem:[%s8392_s1 + $0x130] sm:$0xff]   ;;  %vm4493_vm7 = vcmask 80896  }
   0x3   :  { %5521 = vmatpush3.bf16.msra.mxu0 %v6732_v0  ;;  %5721 = vmatpush3.bf16.msra.mxu1 %v6733_v1  ;;  %v6738_v6 = vld [vmem:[%s8392_s1 + $0x48] sm:$0xff]   ;;  %v6739_v7 = vld [vmem:[%s8392_s1 + $0x138] sm:$0xff]   ;;  %v6740_v8 = vld [vmem:[%s8392_s1 + $0x50] sm:$0xff]  }
   0x4   :  { %5522 = vmatprep.subr.bf16.mxu0 %v6734_v2  ;;  %5722 = vmatprep.subr.bf16.mxu1 %v6735_v3  ;;  %v7014_v9 = vld [vmem:[%s8393_s0 + $0x4] sm:$0xf]  ;;  %v7019_v10 = vld [vmem:[%s8393_s0 + $0x8] sm:$0xf]  ;;  %v6742_v13 = vld [vmem:[%s8392_s1 + $0x58] sm:$0xff]  }
   0x5   :  { %v6741_v11 = vld [vmem:[%s8392_s1 + $0x140] sm:$0xff]   ;;  %v4511_v12 = vcombine.low %v7014_v9, %v7019_v10  ;;  %v6743_v14 = vld [vmem:[%s8392_s1 + $0x148] sm:$0xff]   ;;  %v7042_v16 = vld [vmem:[%s8393_s0 + $0x10] sm:$0xf] }
   0x6   :  { %v7037_v15 = vld [vmem:[%s8393_s0 + $0xc] sm:$0xf]  ;;  %v7047_v17 = vld [vmem:[%s8393_s0 + $0x14] sm:$0xf]  ;;  %v6749_v18 = vld [vmem:[%s8392_s1] sm:$0xff]  }
   0x7   :  { %5523 = vmatpush3.bf16.msra.mxu0 %v6734_v2  ;;  %5723 = vmatpush3.bf16.msra.mxu1 %v6735_v3  ;;  %v6750_v19 = vld [vmem:[%s8392_s1 + $0xf0] sm:$0xff]   ;;  %v7058_v20 = vld [vmem:[%s8393_s0 + $0x18] sm:$0xf]  ;;  %v7062_v21 = vcombine.low %v7037_v15, %v7042_v16  ;;  %v7071_v23 = vld [vmem:[%s8393_s0 + $0x1c] sm:$0xf] }
   0x8   :  { %5524 = vmatprep.subr.bf16.mxu0 %v6736_v4  ;;  %5724 = vmatprep.subr.bf16.mxu1 %v6737_v5  ;;  %v7066_v22 = vcombine.low %v7047_v17, %v7058_v20  ;;  %v6754_v24 = vld [vmem:[%s8392_s1 + $0x8] sm:$0xff]   ;;  %v7081_v25 = vld [vmem:[%s8393_s0 + $0x20] sm:$0xf]  ;;  %v6755_v26 = vld [vmem:[%s8392_s1 + $0xf8] sm:$0xff]  }
   0x9   :  { %5532 = vmatprep.mubr.msk.bf16.mxu0 %vm202_vm0, %v4511_v12  ;;  %5732 = vmatprep.mubr.msk.bf16.mxu1 %vm202_vm0, %v4511_v12  ;;  %v7089_v27 = vld [vmem:[%s8393_s0 + $0x24] sm:$0xf]  ;;  %v7096_v28 = vld [vmem:[%s8393_s0 + $0x28] sm:$0xf]  ;;  %v6760_v29 = vld [vmem:[%s8392_s1 + $0x10] sm:$0xff]   ;;  %v7110_v31 = vcombine.low %v7071_v23, %v7081_v25  ;;  %v7346_v12 = vcombine.low %v7058_v20, %v7071_v23 }
   0xa   :  { %v6761_v30 = vld [vmem:[%s8392_s1 + $0x100] sm:$0xff]   ;;  %v7114_v32 = vcombine.low %v7089_v27, %v7096_v28  ;;  %v7119_v33 = vld [vmem:[%s8393_s0 + $0x2c] sm:$0xf]  ;;  %v7124_v34 = vld [vmem:[%s8393_s0 + $0x30] sm:$0xf] }
   0xb   :  { %5525 = vmatpush3.bf16.msra.mxu0 %v6736_v4  ;;  %5725 = vmatpush3.bf16.msra.mxu1 %v6737_v5  ;;  %v6766_v35 = vld [vmem:[%s8392_s1 + $0x18] sm:$0xff]   ;;  %v6767_v36 = vld [vmem:[%s8392_s1 + $0x108] sm:$0xff]   ;;  %v7141_v37 = vld [vmem:[%s8393_s0 + $0x34] sm:$0xf]  ;;  %v7155_v40 = vcombine.low %v7119_v33, %v7124_v34 }
   0xc   :  { %5526 = vmatprep.subr.bf16.mxu0 %v6738_v6  ;;  %5726 = vmatprep.subr.bf16.mxu1 %v6739_v7  ;;  %v7148_v38 = vld [vmem:[%s8393_s0 + $0x38] sm:$0xf]  ;;  %v6772_v39 = vld [vmem:[%s8392_s1 + $0x20] sm:$0xff]   ;;  %v6773_v41 = vld [vmem:[%s8392_s1 + $0x110] sm:$0xff]  }
   0xd   :  { %v7162_v42 = vcombine.low %v7141_v37, %v7148_v38  ;;  %v7167_v43 = vld [vmem:[%s8393_s0 + $0x3c] sm:$0xf]  ;;  %v7172_v44 = vld [vmem:[%s8393_s0 + $0x40] sm:$0xf]  ;;  %v6780_v45 = vld [vmem:[%s8392_s1 + $0x28] sm:$0xff]  }
   0xe   :  { %v6781_v46 = vld [vmem:[%s8392_s1 + $0x118] sm:$0xff]   ;;  %v7189_v47 = vld [vmem:[%s8393_s0 + $0x44] sm:$0xf]  ;;  %v7196_v48 = vld [vmem:[%s8393_s0 + $0x48] sm:$0xf]  ;;  %v7203_v50 = vcombine.low %v7167_v43, %v7172_v44 }
   0xf   :  { %5527 = vmatpush3.bf16.msra.mxu0 %v6738_v6  ;;  %5727 = vmatpush3.bf16.msra.mxu1 %v6739_v7  ;;  %v6784_v49 = vld [vmem:[%s8392_s1 + $0x60] sm:$0xff]   ;;  %v6785_v51 = vld [vmem:[%s8392_s1 + $0x150] sm:$0xff]   ;;  %v7210_v52 = vcombine.low %v7189_v47, %v7196_v48  ;;  %v7215_v53 = vld [vmem:[%s8393_s0 + $0x4c] sm:$0xf]  ;;  %v7318_v6 = vcombine.low %v7019_v10, %v7037_v15  ;;  %v7322_v7 = vcombine.low %v7042_v16, %v7047_v17 }
  0x10   :  { %5528 = vmatprep.subr.bf16.mxu0 %v6740_v8  ;;  %5728 = vmatprep.subr.bf16.mxu1 %v6741_v11  ;;  %v7222_v54 = vld [vmem:[%s8393_s0 + $0x50] sm:$0xf]  ;;  %v7231_v55 = vld [vmem:[%s8393_s0 + $0x54] sm:$0xf]  ;;  %v7238_v56 = vld [vmem:[%s8393_s0 + $0x58] sm:$0xf]  ;;  %v7371_v17 = vcombine.low %v7096_v28, %v7119_v33  ;;  %v7418_v28 = vcombine.low %v7196_v48, %v7215_v53 }
  0x11   :  { %v7242_v57 = vcombine.low %v7215_v53, %v7222_v54  ;;  %v7246_v58 = vcombine.low %v7231_v55, %v7238_v56  ;;  %v7251_v59 = vld [vmem:[%s8393_s0 + $0x5c] sm:$0xf]  ;;  %v7256_v60 = vld [vmem:[%s8393_s0 + $0x60] sm:$0xf]  ;;  %v7263_v61 = vld [vmem:[%s8393_s0 + $0x64] sm:$0xf] }
  0x12   :  { %v7268_v62 = vld [vmem:[%s8393_s0 + $0x68] sm:$0xf]  ;;  %v7278_v63 = vcombine.low %v7251_v59, %v7256_v60  ;;  %v7293_v1 = vld [vmem:[%s8393_s0 + $0x6c] sm:$0xf]  ;;  %v7298_v2 = vld [vmem:[%s8393_s0 + $0x70] sm:$0xf]  ;;  %v7438_v33 = vcombine.low %v7256_v60, %v7263_v61 }
  0x13   :  { %5529 = vmatpush3.bf16.msra.mxu0 %v6740_v8  ;;  %5729 = vmatpush3.bf16.msra.mxu1 %v6741_v11  ;;  %v7282_v0 = vcombine.low %v7263_v61, %v7268_v62  ;;  %v39_v3 = vld [vmem:[%s8393_s0] sm:$0xf]  ;;  %v7307_v4 = vcombine.low %v7293_v1, %v7298_v2  ;;  %v6786_v8 = vld [vmem:[%s8392_s1 + $0x68] sm:$0xff]   ;;  %v6788_v10 = vld [vmem:[%s8392_s1 + $0x70] sm:$0xff]  }
  0x14   :  { %5530 = vmatprep.subr.bf16.mxu0 %v6742_v13  ;;  %5730 = vmatprep.subr.bf16.mxu1 %v6743_v14  ;;  %v4545_v5 = vcombine.low %v39_v3, %v7014_v9  ;;  %v6787_v9 = vld [vmem:[%s8392_s1 + $0x158] sm:$0xff]   ;;  %v6789_v11 = vld [vmem:[%s8392_s1 + $0x160] sm:$0xff]   ;;  %v6791_v15 = vld [vmem:[%s8392_s1 + $0x168] sm:$0xff]  }
  0x15   :  { %v6792_v16 = vld [vmem:[%s8392_s1 + $0x80] sm:$0xff]   ;;  %v6794_v20 = vld [vmem:[%s8392_s1 + $0x88] sm:$0xff]   ;;  %v6795_v23 = vld [vmem:[%s8392_s1 + $0x178] sm:$0xff]  }
  0x16   :  { %v6810_v48 = vld [vmem:[%s8392_s1 + $0x1b0] sm:$0xff]   ;;  %v6811_v53 = vld [vmem:[%s8392_s1 + $0xc8] sm:$0xff]   ;;  %v6820_v60 = vld [vmem:[%s8392_s1 + $0x1d8] sm:$0xff]  }
  0x17   :  { %5531 = vmatpush3.bf16.msra.mxu0 %v6742_v13  ;;  %5731 = vmatpush3.bf16.msra.mxu1 %v6743_v14  ;;  %v7350_v13 = vcombine.low %v7081_v25, %v7089_v27  ;;  %v6790_v14 = vld [vmem:[%s8392_s1 + $0x78] sm:$0xff]   ;;  %v7399_v25 = vcombine.low %v7148_v38, %v7167_v43  ;;  %v7406_v27 = vcombine.low %v7172_v44, %v7189_v47  ;;  %v6801_v38 = vld [vmem:[%s8392_s1 + $0x190] sm:$0xff]   ;;  %v6805_v44 = vld [vmem:[%s8392_s1 + $0x1a0] sm:$0xff]  }
  0x18   :  { %5560 = vmatprep.subr.bf16.mxu0 %v6749_v18  ;;  %5760 = vmatprep.subr.bf16.mxu1 %v6750_v19  ;;  %v6804_v43 = vld [vmem:[%s8392_s1 + $0xb0] sm:$0xff]   ;;  %v6809_v47 = vld [vmem:[%s8392_s1 + $0xc0] sm:$0xff]  }
  0x19   :  { %v6826_v61 = vld [vmem:[%s8394_s3 + $0x110] sm:$0xff]  }
  0x1a   :  { %5533 = vmatmul.mubr.msk.bf16.vlgmr.msra.gmra.mrb[0].mxu0 %vm202_vm0, %v7062_v21  ;;  %5733 = vmatmul.mubr.msk.bf16.vlgmr.msra.gmra.mrb[0].mxu1 %vm202_vm0, %v7062_v21 }
  0x1b   :  { %5561 = vmatpush3.bf16.msra.mxu0 %v6749_v18  ;;  %5761 = vmatpush3.bf16.msra.mxu1 %v6750_v19  ;;  %v6793_v18 = vld [vmem:[%s8392_s1 + $0x170] sm:$0xff]   ;;  %v7378_v19 = vcombine.low %v7124_v34, %v7141_v37  ;;  %v7450_v34 = vcombine.low %v7268_v62, %v7293_v1  ;;  %v6800_v37 = vld [vmem:[%s8392_s1 + $0xa0] sm:$0xff]  }
  0x1c   :  { %5536 = vmatprep.mubr.msk.bf16.mxu0 %vm202_vm0, %v7066_v22  ;;  %5736 = vmatprep.mubr.msk.bf16.mxu1 %vm202_vm0, %v7066_v22  ;;  %v6827_v62 = vld [vmem:[%s8394_s3 + $0x3c] sm:$0xff]  }
  0x1d   :  { %5562 = vmatprep.subr.bf16.mxu0 %v6754_v24  ;;  %5762 = vmatprep.subr.bf16.mxu1 %v6755_v26  ;;  %v6830_v1 = vld [vmem:[%s8394_s3 + $0x120] sm:$0xff]  }
  0x1f   :  { %5563 = vmatpush3.bf16.msra.mxu0 %v6754_v24  ;;  %5763 = vmatpush3.bf16.msra.mxu1 %v6755_v26  ;;  %v6796_v24 = vld [vmem:[%s8392_s1 + $0x90] sm:$0xff]   ;;  %v6797_v26 = vld [vmem:[%s8392_s1 + $0x180] sm:$0xff]  }
  0x20   :  { %5564 = vmatprep.subr.bf16.mxu0 %v6760_v29  ;;  %5764 = vmatprep.subr.bf16.mxu1 %v6761_v30 }
  0x22   :  { %5537 = vmatmul.mubr.msk.bf16.gmra.mrb[4].mxu0 %vm202_vm0, %v7110_v31  ;;  %5737 = vmatmul.mubr.msk.bf16.gmra.mrb[4].mxu1 %vm202_vm0, %v7110_v31 }
  0x23   :  { %5540 = vmatprep.mubr.msk.bf16.mxu0 %vm202_vm0, %v7114_v32  ;;  %5740 = vmatprep.mubr.msk.bf16.mxu1 %vm202_vm0, %v7114_v32 }
  0x24   :  { %5565 = vmatpush3.bf16.msra.mxu0 %v6760_v29  ;;  %5765 = vmatpush3.bf16.msra.mxu1 %v6761_v30  ;;  %v7422_v29 = vcombine.low %v7222_v54, %v7231_v55  ;;  %v7434_v30 = vcombine.low %v7238_v56, %v7251_v59  ;;  %v6812_v54 = vld [vmem:[%s8392_s1 + $0x1b8] sm:$0xff]   ;;  %v6813_v55 = vld [vmem:[%s8392_s1 + $0xd0] sm:$0xff]  }
  0x25   :  { %5566 = vmatprep.subr.bf16.mxu0 %v6766_v35  ;;  %5766 = vmatprep.subr.bf16.mxu1 %v6767_v36  ;;  %v6815_v56 = vld [vmem:[%s8392_s1 + $0xd8] sm:$0xff]   ;;  %v6818_v59 = vld [vmem:[%s8392_s1 + $0x1d0] sm:$0xff]  }
  0x28   :  { %5567 = vmatpush3.bf16.msra.mxu0 %v6766_v35  ;;  %5767 = vmatpush3.bf16.msra.mxu1 %v6767_v36  ;;  %v6798_v35 = vld [vmem:[%s8392_s1 + $0x98] sm:$0xff]   ;;  %v6799_v36 = vld [vmem:[%s8392_s1 + $0x188] sm:$0xff]  }
  0x29   :  { %5568 = vmatprep.subr.bf16.mxu0 %v6772_v39  ;;  %5768 = vmatprep.subr.bf16.mxu1 %v6773_v41 }
  0x2a   :  { %5541 = vmatmul.mubr.msk.bf16.gmra.mrb[8].mxu0 %vm202_vm0, %v7155_v40  ;;  %5741 = vmatmul.mubr.msk.bf16.gmra.mrb[8].mxu1 %vm202_vm0, %v7155_v40 }
  0x2b   :  { %5544 = vmatprep.mubr.msk.bf16.mxu0 %vm202_vm0, %v7162_v42  ;;  %5744 = vmatprep.mubr.msk.bf16.mxu1 %vm202_vm0, %v7162_v42 }
  0x2c   :  { %5569 = vmatpush3.bf16.msra.mxu0 %v6772_v39  ;;  %5769 = vmatpush3.bf16.msra.mxu1 %v6773_v41  ;;  %v6802_v39 = vld [vmem:[%s8392_s1 + $0xa8] sm:$0xff]   ;;  %v6803_v41 = vld [vmem:[%s8392_s1 + $0x198] sm:$0xff]  }
  0x2d   :  { %5570 = vmatprep.subr.bf16.mxu0 %v6780_v45  ;;  %5770 = vmatprep.subr.bf16.mxu1 %v6781_v46 }
  0x30   :  { %5571 = vmatpush3.bf16.msra.mxu0 %v6780_v45  ;;  %5771 = vmatpush3.bf16.msra.mxu1 %v6781_v46  ;;  %v6806_v45 = vld [vmem:[%s8392_s1 + $0xb8] sm:$0xff]   ;;  %v6807_v46 = vld [vmem:[%s8392_s1 + $0x1a8] sm:$0xff]  }
  0x31   :  { %5600 = vmatprep.subr.bf16.mxu0 %v6784_v49  ;;  %5800 = vmatprep.subr.bf16.mxu1 %v6785_v51 }
  0x32   :  { %5545 = vmatmul.mubr.msk.bf16.gmra.mrb[12].mxu0 %vm202_vm0, %v7203_v50  ;;  %5745 = vmatmul.mubr.msk.bf16.gmra.mrb[12].mxu1 %vm202_vm0, %v7203_v50 }
  0x33   :  { %5548 = vmatprep.mubr.msk.bf16.mxu0 %vm202_vm0, %v7210_v52  ;;  %5748 = vmatprep.mubr.msk.bf16.mxu1 %vm202_vm0, %v7210_v52 }
  0x3a   :  { %5549 = vmatmul.mubr.msk.bf16.gmra.mrb[16].mxu0 %vm202_vm0, %v7242_v57  ;;  %5749 = vmatmul.mubr.msk.bf16.gmra.mrb[16].mxu1 %vm202_vm0, %v7242_v57 }
  0x3b   :  { %5552 = vmatprep.mubr.msk.bf16.mxu0 %vm202_vm0, %v7246_v58  ;;  %5752 = vmatprep.mubr.msk.bf16.mxu1 %vm202_vm0, %v7246_v58 }
  0x42   :  { %5553 = vmatmul.mubr.msk.bf16.gmra.mrb[20].mxu0 %vm202_vm0, %v7278_v63  ;;  %5753 = vmatmul.mubr.msk.bf16.gmra.mrb[20].mxu1 %vm202_vm0, %v7278_v63 }
  0x43   :  { %5556 = vmatprep.mubr.msk.bf16.mxu0 %vm202_vm0, %v7282_v0  ;;  %5756 = vmatprep.mubr.msk.bf16.mxu1 %vm202_vm0, %v7282_v0 }
  0x4a   :  { %5557 = vmatmul.mubr.msk.bf16.gmra.mrb[24].mxu0 %vm202_vm0, %v7307_v4  ;;  %5757 = vmatmul.mubr.msk.bf16.gmra.mrb[24].mxu1 %vm202_vm0, %v7307_v4 }
  0x4b   :  { %5572 = vmatprep.mubr.msk.bf16.mxu0 %vm202_vm0, %v4545_v5  ;;  %5772 = vmatprep.mubr.msk.bf16.mxu1 %vm202_vm0, %v4545_v5  ;;  %v6832_v5 = vld [vmem:[%s8394_s3 + $0x128] sm:$0xff]  }
  0x52   :  { %5573 = vmatmul.mubr.msk.bf16.vlgmr.msra.gmra.mrb[0].mxu0 %vm202_vm0, %v7318_v6  ;;  %5773 = vmatmul.mubr.msk.bf16.vlgmr.msra.gmra.mrb[0].mxu1 %vm202_vm0, %v7318_v6 }
  0x53   :  { %5601 = vmatpush3.bf16.msra.mxu0 %v6784_v49  ;;  %5801 = vmatpush3.bf16.msra.mxu1 %v6785_v51  ;;  %v7545_v49 = vld [vmem:[%s8393_s0 + $0x74] sm:$0xf] }
  0x54   :  { %5576 = vmatprep.mubr.msk.bf16.mxu0 %vm202_vm0, %v7322_v7  ;;  %5776 = vmatprep.mubr.msk.bf16.mxu1 %vm202_vm0, %v7322_v7  ;;  %v7551_v51 = vcombine.low %v7298_v2, %v7545_v49  ;;  %v70_v2 = vld [vmem:[%s8393_s0 + $0x7c] sm:$0xf] }
  0x55   :  { %5602 = vmatprep.subr.bf16.mxu0 %v6786_v8  ;;  %5802 = vmatprep.subr.bf16.mxu1 %v6787_v9 }
  0x57   :  { %5603 = vmatpush3.bf16.msra.mxu0 %v6786_v8  ;;  %5803 = vmatpush3.bf16.msra.mxu1 %v6787_v9 }
  0x58   :  { %5604 = vmatprep.subr.bf16.mxu0 %v6788_v10  ;;  %5804 = vmatprep.subr.bf16.mxu1 %v6789_v11 }
  0x5a   :  { %5577 = vmatmul.mubr.msk.bf16.gmra.mrb[4].mxu0 %vm202_vm0, %v7346_v12  ;;  %5777 = vmatmul.mubr.msk.bf16.gmra.mrb[4].mxu1 %vm202_vm0, %v7346_v12 }
  0x5b   :  { %5580 = vmatprep.mubr.msk.bf16.mxu0 %vm202_vm0, %v7350_v13  ;;  %5780 = vmatprep.mubr.msk.bf16.mxu1 %vm202_vm0, %v7350_v13 }
  0x5c   :  { %5605 = vmatpush3.bf16.msra.mxu0 %v6788_v10  ;;  %5805 = vmatpush3.bf16.msra.mxu1 %v6789_v11 }
  0x5d   :  { %5606 = vmatprep.subr.bf16.mxu0 %v6790_v14  ;;  %5806 = vmatprep.subr.bf16.mxu1 %v6791_v15 }
  0x60   :  { %5607 = vmatpush3.bf16.msra.mxu0 %v6790_v14  ;;  %5807 = vmatpush3.bf16.msra.mxu1 %v6791_v15 }
  0x61   :  { %5608 = vmatprep.subr.bf16.mxu0 %v6792_v16  ;;  %5808 = vmatprep.subr.bf16.mxu1 %v6793_v18 }
  0x62   :  { %5581 = vmatmul.mubr.msk.bf16.gmra.mrb[8].mxu0 %vm202_vm0, %v7371_v17  ;;  %5781 = vmatmul.mubr.msk.bf16.gmra.mrb[8].mxu1 %vm202_vm0, %v7371_v17 }
  0x63   :  { %5584 = vmatprep.mubr.msk.bf16.mxu0 %vm202_vm0, %v7378_v19  ;;  %5784 = vmatprep.mubr.msk.bf16.mxu1 %vm202_vm0, %v7378_v19 }
  0x64   :  { %5609 = vmatpush3.bf16.msra.mxu0 %v6792_v16  ;;  %5809 = vmatpush3.bf16.msra.mxu1 %v6793_v18 }
  0x65   :  { %5610 = vmatprep.subr.bf16.mxu0 %v6794_v20  ;;  %5810 = vmatprep.subr.bf16.mxu1 %v6795_v23 }
  0x68   :  { %5611 = vmatpush3.bf16.msra.mxu0 %v6794_v20  ;;  %5811 = vmatpush3.bf16.msra.mxu1 %v6795_v23  ;;  %v7761_v23 = vld [vmem:[%s8395_s2] ss:$0 sm:$0xff] }
  0x69   :  { %5640 = vmatprep.subr.bf16.mxu0 %v6796_v24  ;;  %5840 = vmatprep.subr.bf16.mxu1 %v6797_v26 }
  0x6a   :  { %5585 = vmatmul.mubr.msk.bf16.gmra.mrb[12].mxu0 %vm202_vm0, %v7399_v25  ;;  %5785 = vmatmul.mubr.msk.bf16.gmra.mrb[12].mxu1 %vm202_vm0, %v7399_v25 }
  0x6b   :  { %5588 = vmatprep.mubr.msk.bf16.mxu0 %vm202_vm0, %v7406_v27  ;;  %5788 = vmatprep.mubr.msk.bf16.mxu1 %vm202_vm0, %v7406_v27 }
  0x72   :  { %5589 = vmatmul.mubr.msk.bf16.gmra.mrb[16].mxu0 %vm202_vm0, %v7418_v28  ;;  %5789 = vmatmul.mubr.msk.bf16.gmra.mrb[16].mxu1 %vm202_vm0, %v7418_v28 }
  0x73   :  { %5592 = vmatprep.mubr.msk.bf16.mxu0 %vm202_vm0, %v7422_v29  ;;  %5792 = vmatprep.mubr.msk.bf16.mxu1 %vm202_vm0, %v7422_v29 }
  0x7a   :  { %5593 = vmatmul.mubr.msk.bf16.gmra.mrb[20].mxu0 %vm202_vm0, %v7434_v30  ;;  %5793 = vmatmul.mubr.msk.bf16.gmra.mrb[20].mxu1 %vm202_vm0, %v7434_v30 }
  0x7b   :  { %5596 = vmatprep.mubr.msk.bf16.mxu0 %vm202_vm0, %v7438_v33  ;;  %5796 = vmatprep.mubr.msk.bf16.mxu1 %vm202_vm0, %v7438_v33 }
  0x82   :  { %5597 = vmatmul.mubr.msk.bf16.gmra.mrb[24].mxu0 %vm202_vm0, %v7450_v34  ;;  %5797 = vmatmul.mubr.msk.bf16.gmra.mrb[24].mxu1 %vm202_vm0, %v7450_v34 }
  0x83   :  { %5612 = vmatprep.mubr.msk.bf16.mxu0 %vm202_vm0, %v7318_v6  ;;  %5812 = vmatprep.mubr.msk.bf16.mxu1 %vm202_vm0, %v7318_v6  ;;  %v6833_v6 = vld [vmem:[%s8394_s3 + $0x54] ss:$0 sps:$4 sm:$0x33]  }
  0x84   :  { %v2557_v8 = vsel %vm2555_vm1, %v6833_v6, 0  ;;  %v6838_v6 = vld [vmem:[%s8394_s3 + $0xe4] sm:$0xff]  }
  0x8a   :  { %5613 = vmatmul.mubr.msk.bf16.vlgmr.msra.gmra.mrb[0].mxu0 %vm202_vm0, %v7322_v7  ;;  %5813 = vmatmul.mubr.msk.bf16.vlgmr.msra.gmra.mrb[0].mxu1 %vm202_vm0, %v7322_v7 }
  0x8b   :  { %5641 = vmatpush3.bf16.msra.mxu0 %v6796_v24  ;;  %5841 = vmatpush3.bf16.msra.mxu1 %v6797_v26 }
  0x8c   :  { %5616 = vmatprep.mubr.msk.bf16.mxu0 %vm202_vm0, %v7346_v12  ;;  %5816 = vmatprep.mubr.msk.bf16.mxu1 %vm202_vm0, %v7346_v12 }
  0x8d   :  { %5642 = vmatprep.subr.bf16.mxu0 %v6798_v35  ;;  %5842 = vmatprep.subr.bf16.mxu1 %v6799_v36 }
  0x8f   :  { %5643 = vmatpush3.bf16.msra.mxu0 %v6798_v35  ;;  %5843 = vmatpush3.bf16.msra.mxu1 %v6799_v36 }
  0x90   :  { %5644 = vmatprep.subr.bf16.mxu0 %v6800_v37  ;;  %5844 = vmatprep.subr.bf16.mxu1 %v6801_v38 }
  0x92   :  { %5617 = vmatmul.mubr.msk.bf16.gmra.mrb[4].mxu0 %vm202_vm0, %v7350_v13  ;;  %5817 = vmatmul.mubr.msk.bf16.gmra.mrb[4].mxu1 %vm202_vm0, %v7350_v13 }
  0x93   :  { %5620 = vmatprep.mubr.msk.bf16.mxu0 %vm202_vm0, %v7371_v17  ;;  %5820 = vmatprep.mubr.msk.bf16.mxu1 %vm202_vm0, %v7371_v17 }
  0x94   :  { %5645 = vmatpush3.bf16.msra.mxu0 %v6800_v37  ;;  %5845 = vmatpush3.bf16.msra.mxu1 %v6801_v38 }
  0x95   :  { %5646 = vmatprep.subr.bf16.mxu0 %v6802_v39  ;;  %5846 = vmatprep.subr.bf16.mxu1 %v6803_v41 }
  0x98   :  { %5647 = vmatpush3.bf16.msra.mxu0 %v6802_v39  ;;  %5847 = vmatpush3.bf16.msra.mxu1 %v6803_v41 }
  0x99   :  { %5648 = vmatprep.subr.bf16.mxu0 %v6804_v43  ;;  %5848 = vmatprep.subr.bf16.mxu1 %v6805_v44 }
  0x9a   :  { %5621 = vmatmul.mubr.msk.bf16.gmra.mrb[8].mxu0 %vm202_vm0, %v7378_v19  ;;  %5821 = vmatmul.mubr.msk.bf16.gmra.mrb[8].mxu1 %vm202_vm0, %v7378_v19 }
  0x9b   :  { %5624 = vmatprep.mubr.msk.bf16.mxu0 %vm202_vm0, %v7399_v25  ;;  %5824 = vmatprep.mubr.msk.bf16.mxu1 %vm202_vm0, %v7399_v25 }
  0x9c   :  { %5649 = vmatpush3.bf16.msra.mxu0 %v6804_v43  ;;  %5849 = vmatpush3.bf16.msra.mxu1 %v6805_v44 }
  0x9d   :  { %5650 = vmatprep.subr.bf16.mxu0 %v6806_v45  ;;  %5850 = vmatprep.subr.bf16.mxu1 %v6807_v46 }
  0xa0   :  { %5651 = vmatpush3.bf16.msra.mxu0 %v6806_v45  ;;  %5851 = vmatpush3.bf16.msra.mxu1 %v6807_v46 }
  0xa1   :  { %5680 = vmatprep.subr.bf16.mxu0 %v6809_v47  ;;  %5880 = vmatprep.subr.bf16.mxu1 %v6810_v48 }
  0xa2   :  { %5625 = vmatmul.mubr.msk.bf16.gmra.mrb[12].mxu0 %vm202_vm0, %v7406_v27  ;;  %5825 = vmatmul.mubr.msk.bf16.gmra.mrb[12].mxu1 %vm202_vm0, %v7406_v27 }
  0xa3   :  { %5628 = vmatprep.mubr.msk.bf16.mxu0 %vm202_vm0, %v7418_v28  ;;  %5828 = vmatprep.mubr.msk.bf16.mxu1 %vm202_vm0, %v7418_v28 }
  0xaa   :  { %5629 = vmatmul.mubr.msk.bf16.gmra.mrb[16].mxu0 %vm202_vm0, %v7422_v29  ;;  %5829 = vmatmul.mubr.msk.bf16.gmra.mrb[16].mxu1 %vm202_vm0, %v7422_v29 }
  0xab   :  { %5632 = vmatprep.mubr.msk.bf16.mxu0 %vm202_vm0, %v7434_v30  ;;  %5832 = vmatprep.mubr.msk.bf16.mxu1 %vm202_vm0, %v7434_v30 }
  0xb2   :  { %5633 = vmatmul.mubr.msk.bf16.gmra.mrb[20].mxu0 %vm202_vm0, %v7438_v33  ;;  %5833 = vmatmul.mubr.msk.bf16.gmra.mrb[20].mxu1 %vm202_vm0, %v7438_v33 }
  0xb3   :  { %5636 = vmatprep.mubr.msk.bf16.mxu0 %vm202_vm0, %v7450_v34  ;;  %5836 = vmatprep.mubr.msk.bf16.mxu1 %vm202_vm0, %v7450_v34 }
  0xba   :  { %5637 = vmatmul.mubr.msk.bf16.gmra.mrb[24].mxu0 %vm202_vm0, %v7551_v51  ;;  %5837 = vmatmul.mubr.msk.bf16.gmra.mrb[24].mxu1 %vm202_vm0, %v7551_v51 }
  0xbb   :  { %5652 = vmatprep.mubr.msk.bf16.mxu0 %vm202_vm0, %v7062_v21  ;;  %5852 = vmatprep.mubr.msk.bf16.mxu1 %vm202_vm0, %v7062_v21  ;;  %v6814_v21 = vld [vmem:[%s8392_s1 + $0x1c0] sm:$0xff]  }
  0xc2   :  { %5653 = vmatmul.mubr.msk.bf16.vlgmr.msra.gmra.mrb[0].mxu0 %vm202_vm0, %v7066_v22  ;;  %5853 = vmatmul.mubr.msk.bf16.vlgmr.msra.gmra.mrb[0].mxu1 %vm202_vm0, %v7066_v22  ;;  %v6816_v22 = vld [vmem:[%s8392_s1 + $0x1c8] sm:$0xff]  }
  0xc3   :  { %5681 = vmatpush3.bf16.msra.mxu0 %v6809_v47  ;;  %5881 = vmatpush3.bf16.msra.mxu1 %v6810_v48 }
  0xc4   :  { %5656 = vmatprep.mubr.msk.bf16.mxu0 %vm202_vm0, %v7110_v31  ;;  %5856 = vmatprep.mubr.msk.bf16.mxu1 %vm202_vm0, %v7110_v31  ;;  %v6817_v31 = vld [vmem:[%s8392_s1 + $0xe0] sm:$0xff]  }
  0xc5   :  { %5682 = vmatprep.subr.bf16.mxu0 %v6811_v53  ;;  %5882 = vmatprep.subr.bf16.mxu1 %v6812_v54 }
  0xc7   :  { %5683 = vmatpush3.bf16.msra.mxu0 %v6811_v53  ;;  %5883 = vmatpush3.bf16.msra.mxu1 %v6812_v54 }
  0xc8   :  { %5684 = vmatprep.subr.bf16.mxu0 %v6813_v55  ;;  %5884 = vmatprep.subr.bf16.mxu1 %v6814_v21 }
  0xca   :  { %5657 = vmatmul.mubr.msk.bf16.gmra.mrb[4].mxu0 %vm202_vm0, %v7114_v32  ;;  %5857 = vmatmul.mubr.msk.bf16.gmra.mrb[4].mxu1 %vm202_vm0, %v7114_v32  ;;  %v6819_v32 = vld [vmem:[%s8392_s1 + $0xe8] sm:$0xff]  }
  0xcb   :  { %5660 = vmatprep.mubr.msk.bf16.mxu0 %vm202_vm0, %v7155_v40  ;;  %5860 = vmatprep.mubr.msk.bf16.mxu1 %vm202_vm0, %v7155_v40  ;;  %v6922_v40 = vmov 0.0  }
  0xcc   :  { %5685 = vmatpush3.bf16.msra.mxu0 %v6813_v55  ;;  %5885 = vmatpush3.bf16.msra.mxu1 %v6814_v21 }
  0xcd   :  { %5686 = vmatprep.subr.bf16.mxu0 %v6815_v56  ;;  %5886 = vmatprep.subr.bf16.mxu1 %v6816_v22 }
  0xd0   :  { %5687 = vmatpush3.bf16.msra.mxu0 %v6815_v56  ;;  %5887 = vmatpush3.bf16.msra.mxu1 %v6816_v22 }
  0xd1   :  { %5688 = vmatprep.subr.bf16.mxu0 %v6817_v31  ;;  %5888 = vmatprep.subr.bf16.mxu1 %v6818_v59 }
  0xd2   :  { %5661 = vmatmul.mubr.msk.bf16.gmra.mrb[8].mxu0 %vm202_vm0, %v7162_v42  ;;  %5861 = vmatmul.mubr.msk.bf16.gmra.mrb[8].mxu1 %vm202_vm0, %v7162_v42  ;;  %v69_v42 = vld [vmem:[%s8393_s0 + $0x78] sm:$0xf] }
  0xd3   :  { %5664 = vmatprep.mubr.msk.bf16.mxu0 %vm202_vm0, %v7203_v50  ;;  %5864 = vmatprep.mubr.msk.bf16.mxu1 %vm202_vm0, %v7203_v50  ;;  %v4624_v50 = vcombine.low %v7545_v49, %v69_v42  ;;  %v4657_v3 = vcombine.low %v69_v42, %v70_v2 }
  0xd4   :  { %5689 = vmatpush3.bf16.msra.mxu0 %v6817_v31  ;;  %5889 = vmatpush3.bf16.msra.mxu1 %v6818_v59 }
  0xd5   :  { %5690 = vmatprep.subr.bf16.mxu0 %v6819_v32  ;;  %5890 = vmatprep.subr.bf16.mxu1 %v6820_v60 }
  0xd8   :  { %5691 = vmatpush3.bf16.msra.mxu0 %v6819_v32  ;;  %5891 = vmatpush3.bf16.msra.mxu1 %v6820_v60 }
  0xd9   :  { %5920 = vmatprep.subr.bf16.mxu0 %v6922_v40  ;;  %6080 = vmatprep.subr.bf16.mxu1 %v6922_v40 }
  0xda   :  { %5665 = vmatmul.mubr.msk.bf16.gmra.mrb[12].mxu0 %vm202_vm0, %v7210_v52  ;;  %5865 = vmatmul.mubr.msk.bf16.gmra.mrb[12].mxu1 %vm202_vm0, %v7210_v52  ;;  %v6823_v52 = vld [vmem:[%s8394_s3 + $0x2c] sm:$0xff]  }
  0xdb   :  { %5668 = vmatprep.mubr.msk.bf16.mxu0 %vm202_vm0, %v7242_v57  ;;  %5868 = vmatprep.mubr.msk.bf16.mxu1 %vm202_vm0, %v7242_v57  ;;  %v6824_v57 = vld [vmem:[%s8394_s3 + $0x108] sm:$0xff]  }
  0xe2   :  { %5669 = vmatmul.mubr.msk.bf16.gmra.mrb[16].mxu0 %vm202_vm0, %v7246_v58  ;;  %5869 = vmatmul.mubr.msk.bf16.gmra.mrb[16].mxu1 %vm202_vm0, %v7246_v58  ;;  %v6825_v58 = vld [vmem:[%s8394_s3 + $0x34] sm:$0xff]  }
  0xe3   :  { %5672 = vmatprep.mubr.msk.bf16.mxu0 %vm202_vm0, %v7278_v63  ;;  %5872 = vmatprep.mubr.msk.bf16.mxu1 %vm202_vm0, %v7278_v63  ;;  %v6828_v63 = vld [vmem:[%s8394_s3 + $0x118] sm:$0xff]  }
  0xea   :  { %5673 = vmatmul.mubr.msk.bf16.gmra.mrb[20].mxu0 %vm202_vm0, %v7282_v0  ;;  %5873 = vmatmul.mubr.msk.bf16.gmra.mrb[20].mxu1 %vm202_vm0, %v7282_v0  ;;  %v6829_v0 = vld [vmem:[%s8394_s3 + $0x44] sm:$0xff]  }
  0xeb   :  { %5676 = vmatprep.mubr.msk.bf16.mxu0 %vm202_vm0, %v7307_v4  ;;  %5876 = vmatprep.mubr.msk.bf16.mxu1 %vm202_vm0, %v7307_v4  ;;  %v6831_v4 = vld [vmem:[%s8394_s3 + $0x4c] sm:$0xff]  }
  0xf2   :  { %5677 = vmatmul.mubr.msk.bf16.gmra.mrb[24].mxu0 %vm202_vm0, %v4624_v50  ;;  %5877 = vmatmul.mubr.msk.bf16.gmra.mrb[24].mxu1 %vm202_vm0, %v4624_v50 }
  0xf3   :  { %5692 = vmatprep.mubr.msk.bf16.mxu0 %vm202_vm0, %v7322_v7  ;;  %5892 = vmatprep.mubr.msk.bf16.mxu1 %vm202_vm0, %v7322_v7  ;;  %v6834_v7 = vld [vmem:[%s8394_s3 + $0x130] ss:$0 sps:$4 sm:$0x33]  }
  0xf4   :  { %v3237_v9 = vsel %vm2555_vm1, %v6834_v7, 0 }
  0xfa   :  { %5693 = vmatmul.mubr.msk.bf16.vlgmr.msra.gmra.mrb[0].mxu0 %vm202_vm0, %v7346_v12  ;;  %5893 = vmatmul.mubr.msk.bf16.vlgmr.msra.gmra.mrb[0].mxu1 %vm202_vm0, %v7346_v12 }
  0xfb   :  { %5696 = vmatprep.mubr.msk.bf16.mxu0 %vm202_vm0, %v7350_v13  ;;  %5896 = vmatprep.mubr.msk.bf16.mxu1 %vm202_vm0, %v7350_v13 }
  0xfc   :  { %5921 = vmatpush3.bf16.msra.mxu0 %v6823_v52  ;;  %6081 = vmatpush3.bf16.msra.mxu1 %v6824_v57 }
  0xfd   :  { %5922 = vmatprep.subr.bf16.mxu0 %v6922_v40  ;;  %6082 = vmatprep.subr.bf16.mxu1 %v6922_v40 }
 0x100   :  { %5923 = vmatpush3.bf16.msra.mxu0 %v6825_v58  ;;  %6083 = vmatpush3.bf16.msra.mxu1 %v6826_v61  ;;  %v6835_v58 = vld [vmem:[%s8394_s3] sm:$0xff]  }
 0x101   :  { %5924 = vmatprep.subr.bf16.mxu0 %v6922_v40  ;;  %6084 = vmatprep.subr.bf16.mxu1 %v6922_v40  ;;  %v6836_v61 = vld [vmem:[%s8394_s3 + $0xdc] sm:$0xff]  }
 0x102   :  { %5697 = vmatmul.mubr.msk.bf16.gmra.mrb[4].mxu0 %vm202_vm0, %v7371_v17  ;;  %5897 = vmatmul.mubr.msk.bf16.gmra.mrb[4].mxu1 %vm202_vm0, %v7371_v17 }
 0x103   :  { %5700 = vmatprep.mubr.msk.bf16.mxu0 %vm202_vm0, %v7378_v19  ;;  %5900 = vmatprep.mubr.msk.bf16.mxu1 %vm202_vm0, %v7378_v19 }
 0x104   :  { %5925 = vmatpush3.bf16.msra.mxu0 %v6827_v62  ;;  %6085 = vmatpush3.bf16.msra.mxu1 %v6828_v63 }
 0x105   :  { %5926 = vmatprep.subr.bf16.mxu0 %v6922_v40  ;;  %6086 = vmatprep.subr.bf16.mxu1 %v6922_v40 }
 0x108   :  { %5927 = vmatpush3.bf16.msra.mxu0 %v6829_v0  ;;  %6087 = vmatpush3.bf16.msra.mxu1 %v6830_v1 }
 0x109   :  { %5928 = vmatprep.subr.bf16.mxu0 %v6922_v40  ;;  %6088 = vmatprep.subr.bf16.mxu1 %v6922_v40 }
 0x10a   :  { %5701 = vmatmul.mubr.msk.bf16.gmra.mrb[8].mxu0 %vm202_vm0, %v7399_v25  ;;  %5901 = vmatmul.mubr.msk.bf16.gmra.mrb[8].mxu1 %vm202_vm0, %v7399_v25 }
 0x10b   :  { %5704 = vmatprep.mubr.msk.bf16.mxu0 %vm202_vm0, %v7406_v27  ;;  %5904 = vmatprep.mubr.msk.bf16.mxu1 %vm202_vm0, %v7406_v27 }
 0x10c   :  { %5929 = vmatpush3.bf16.msra.mxu0 %v6831_v4  ;;  %6089 = vmatpush3.bf16.msra.mxu1 %v6832_v5  ;;  %v6837_v5 = vld [vmem:[%s8394_s3 + $0x8] sm:$0xff]  }
 0x10d   :  { %5930 = vmatprep.subr.bf16.mxu0 %v6922_v40  ;;  %6090 = vmatprep.subr.bf16.mxu1 %v6922_v40 }
 0x110   :  { %5931 = vmatpush3.bf16.msra.mxu0 %v2557_v8  ;;  %6091 = vmatpush3.bf16.msra.mxu1 %v3237_v9 }
 0x111   :  { %5952 = vmatprep.subr.bf16.mxu0 %v6922_v40  ;;  %6112 = vmatprep.subr.bf16.mxu1 %v6922_v40 }
 0x112   :  { %5705 = vmatmul.mubr.msk.bf16.gmra.mrb[12].mxu0 %vm202_vm0, %v7418_v28  ;;  %5905 = vmatmul.mubr.msk.bf16.gmra.mrb[12].mxu1 %vm202_vm0, %v7418_v28 }
 0x113   :  { %5708 = vmatprep.mubr.msk.bf16.mxu0 %vm202_vm0, %v7422_v29  ;;  %5908 = vmatprep.mubr.msk.bf16.mxu1 %vm202_vm0, %v7422_v29 }
 0x11a   :  { %5709 = vmatmul.mubr.msk.bf16.gmra.mrb[16].mxu0 %vm202_vm0, %v7434_v30  ;;  %5909 = vmatmul.mubr.msk.bf16.gmra.mrb[16].mxu1 %vm202_vm0, %v7434_v30 }
 0x11b   :  { %5712 = vmatprep.mubr.msk.bf16.mxu0 %vm202_vm0, %v7438_v33  ;;  %5912 = vmatprep.mubr.msk.bf16.mxu1 %vm202_vm0, %v7438_v33 }
 0x122   :  { %5713 = vmatmul.mubr.msk.bf16.gmra.mrb[20].mxu0 %vm202_vm0, %v7450_v34  ;;  %5913 = vmatmul.mubr.msk.bf16.gmra.mrb[20].mxu1 %vm202_vm0, %v7450_v34 }
 0x123   :  { %5716 = vmatprep.mubr.msk.bf16.mxu0 %vm202_vm0, %v7551_v51  ;;  %5916 = vmatprep.mubr.msk.bf16.mxu1 %vm202_vm0, %v7551_v51 }
 0x12a   :  { %5717 = vmatmul.mubr.msk.bf16.gmra.mrb[24].mxu0 %vm202_vm0, %v4657_v3  ;;  %5917 = vmatmul.mubr.msk.bf16.gmra.mrb[24].mxu1 %vm202_vm0, %v4657_v3 }
 0x12b   :  { %5932 = vmatprep.mubr.msk.bf16.mxu0 %vm6923_vm2, %v6922_v40  ;;  %6092 = vmatprep.mubr.msk.bf16.mxu1 %vm6923_vm2, %v6922_v40 }
 0x1cd   :  { %v5694_v10 = vpop.f32.mrb[0].mxu0  ;;  %v5894_v11 = vpop.f32.mrb[0].mxu1 }
 0x1ce   :  { %v1174_v12 = vpop.f32.mrb[1].mxu0  ;;  %v2242_v13 = vpop.f32.mrb[1].mxu1 }
 0x1cf   :  { %v5695_v14 = vpop.f32.mrb[2].mxu0  ;;  %v5895_v16 = vpop.f32.mrb[2].mxu1 }
 0x1d0   :  { %v1314_v15 = vmax.f32 %v5694_v10, %v5695_v14  ;;  %v1177_v17 = vpop.f32.mrb[3].mxu0  ;;  %v2382_v18 = vmax.f32 %v5894_v11, %v5895_v16  ;;  %v2245_v20 = vpop.f32.mrb[3].mxu1 }
 0x1d1   :  { %v1313_v19 = vmax.f32 %v1174_v12, %v1177_v17  ;;  %v2381_v24 = vmax.f32 %v2242_v13, %v2245_v20  ;;  %v6839_v20 = vld [vmem:[%s8394_s3 + $0x10] sm:$0xff]  }
 0x1d2   :  { %v2396_v25 = vmax.f32 %v1314_v15, %v2382_v18 }
 0x1d3   :  { %v2395_v26 = vmax.f32 %v1313_v19, %v2381_v24 }
 0x1d4   :  { %v2417_v27 = vadd.f32 %v7761_v23, %v2396_v25 }
 0x1d5   :  { %v5698_v28 = vpop.f32.mrb[4].mxu0  ;;  %v2416_v29 = vadd.f32 %v7761_v23, %v2395_v26  ;;  %v5898_v30 = vpop.f32.mrb[4].mxu1 }
 0x1d6   :  { %v1190_v33 = vpop.f32.mrb[5].mxu0  ;;  %v2431_v34 = vmax.f32 %v2417_v27, 0.0  ;;  %v2258_v35 = vpop.f32.mrb[5].mxu1  ;;  %v6840_v27 = vld [vmem:[%s8394_s3 + $0xec] sm:$0xff]  }
 0x1d7   :  { %v5699_v36 = vpop.f32.mrb[6].mxu0  ;;  %v2430_v37 = vmax.f32 %v2416_v29, 0.0  ;;  %v5899_v39 = vpop.f32.mrb[6].mxu1 }
 0x1d8   :  { %v1316_v38 = vmax.f32 %v5698_v28, %v5699_v36  ;;  %v1193_v41 = vpop.f32.mrb[7].mxu0  ;;  %v2384_v43 = vmax.f32 %v5898_v30, %v5899_v39  ;;  %v2261_v45 = vpop.f32.mrb[7].mxu1 }
 0x1d9   :  { %v1315_v44 = vmax.f32 %v1190_v33, %v1193_v41  ;;  %v7765_v46 = vpack.c.bf16 %v2431_v34, %v2430_v37  ;;  %v2383_v47 = vmax.f32 %v2258_v35, %v2261_v45 }
 0x1da   :  { %v2398_v48 = vmax.f32 %v1316_v38, %v2384_v43  ;;  %v6842_v38 = vld [vmem:[%s8394_s3 + $0xf4] sm:$0xff]  }
 0x1db   :  { %v2397_v49 = vmax.f32 %v1315_v44, %v2383_v47 }
 0x1dc   :  { %v2419_v51 = vadd.f32 %v7761_v23, %v2398_v48 }
 0x1dd   :  { %v5702_v53 = vpop.f32.mrb[8].mxu0  ;;  %v2418_v54 = vadd.f32 %v7761_v23, %v2397_v49  ;;  %v5902_v55 = vpop.f32.mrb[8].mxu1 }
 0x1de   :  { %v1206_v21 = vpop.f32.mrb[9].mxu0  ;;  %v2433_v56 = vmax.f32 %v2419_v51, 0.0  ;;  %v2274_v22 = vpop.f32.mrb[9].mxu1 }
 0x1df   :  { %v5703_v31 = vpop.f32.mrb[10].mxu0  ;;  %v2432_v59 = vmax.f32 %v2418_v54, 0.0  ;;  %v5903_v60 = vpop.f32.mrb[10].mxu1 }
 0x1e0   :  { %v1318_v32 = vmax.f32 %v5702_v53, %v5703_v31  ;;  %v1209_v42 = vpop.f32.mrb[11].mxu0  ;;  %v2386_v50 = vmax.f32 %v5902_v55, %v5903_v60  ;;  %v2277_v57 = vpop.f32.mrb[11].mxu1 }
 0x1e1   :  { %v1317_v52 = vmax.f32 %v1206_v21, %v1209_v42  ;;  %v5151_v62 = vpack.c.bf16 %v2432_v59, %v2431_v34  ;;  %v7775_v63 = vpack.c.bf16 %v2433_v56, %v2432_v59  ;;  %v2385_v0 = vmax.f32 %v2274_v22, %v2277_v57  ;;  %v6841_v34 = vld [vmem:[%s8394_s3 + $0x18] sm:$0xff]   ;;  %v6845_v59 = vld [vmem:[%s8394_s3 + $0x28] ss:$0 sps:$4 sm:$0x33]  }
 0x1e2   :  { %v2400_v1 = vmax.f32 %v1318_v32, %v2386_v50  ;;  %v6844_v22 = vld [vmem:[%s8394_s3 + $0xfc] sm:$0xff]   ;;  %v6846_v32 = vld [vmem:[%s8394_s3 + $0x104] ss:$0 sps:$4 sm:$0x33]  }
 0x1e3   :  { %v2399_v2 = vmax.f32 %v1317_v52, %v2385_v0  ;;  %5933 = vmatmul.mubr.msk.bf16.vlgmr.msra.gmra.mrb[28].mxu0 %vm2539_vm3, %v5151_v62  ;;  %6093 = vmatmul.mubr.msk.bf16.vlgmr.msra.gmra.mrb[28].mxu1 %vm2539_vm3, %v5151_v62 }
 0x1e4   :  { %v2421_v3 = vadd.f32 %v7761_v23, %v2400_v1  ;;  %5953 = vmatpush3.bf16.msra.mxu0 %v6835_v58  ;;  %6113 = vmatpush3.bf16.msra.mxu1 %v6836_v61  ;;  %v2688_v1 = vsel %vm2555_vm1, %v6845_v59, 0  ;;  %v6854_v59 = vld [vmem:[%s8394_s3 + $0x14c] sm:$0xff]  }
 0x1e5   :  { %v5706_v4 = vpop.f32.mrb[12].mxu0  ;;  %v2420_v7 = vadd.f32 %v7761_v23, %v2399_v2  ;;  %v5906_v8 = vpop.f32.mrb[12].mxu1  ;;  %5936 = vmatprep.mubr.msk.bf16.mxu0 %vm6923_vm2, %v6922_v40  ;;  %5954 = vmatprep.subr.bf16.mxu0 %v6922_v40  ;;  %v3346_v2 = vsel %vm2555_vm1, %v6846_v32, 0  ;;  %v6855_v32 = vld [vmem:[%s8394_s3 + $0x78] sm:$0xff]  }
 0x1e6   :  { %v1222_v9 = vpop.f32.mrb[13].mxu0  ;;  %v2435_v10 = vmax.f32 %v2421_v3, 0.0  ;;  %v2290_v11 = vpop.f32.mrb[13].mxu1  ;;  %6096 = vmatprep.mubr.msk.bf16.mxu1 %vm6923_vm2, %v6922_v40  ;;  %6114 = vmatprep.subr.bf16.mxu1 %v6922_v40 }
 0x1e7   :  { %v5707_v12 = vpop.f32.mrb[14].mxu0  ;;  %v2434_v13 = vmax.f32 %v2420_v7, 0.0  ;;  %v5907_v15 = vpop.f32.mrb[14].mxu1 }
 0x1e8   :  { %v1320_v14 = vmax.f32 %v5706_v4, %v5707_v12  ;;  %v1225_v16 = vpop.f32.mrb[15].mxu0  ;;  %v2388_v17 = vmax.f32 %v5906_v8, %v5907_v15  ;;  %v2293_v19 = vpop.f32.mrb[15].mxu1  ;;  %5955 = vmatpush3.bf16.msra.mxu0 %v6837_v5  ;;  %6115 = vmatpush3.bf16.msra.mxu1 %v6838_v6 }
 0x1e9   :  { %v1319_v18 = vmax.f32 %v1222_v9, %v1225_v16  ;;  %v7796_v24 = vpack.c.bf16 %v2434_v13, %v2433_v56  ;;  %v7798_v25 = vpack.c.bf16 %v2435_v10, %v2434_v13  ;;  %v2387_v26 = vmax.f32 %v2290_v11, %v2293_v19  ;;  %5956 = vmatprep.subr.bf16.mxu0 %v6922_v40  ;;  %v6843_v56 = vld [vmem:[%s8394_s3 + $0x20] sm:$0xff]  }
 0x1ea   :  { %6116 = vmatprep.subr.bf16.mxu1 %v6922_v40  ;;  %v2402_v28 = vmax.f32 %v1320_v14, %v2388_v17 }
 0x1eb   :  { %v2401_v29 = vmax.f32 %v1319_v18, %v2387_v26  ;;  %5937 = vmatmul.mubr.msk.bf16.gmra.mrb[32].mxu0 %vm2539_vm3, %v7796_v24  ;;  %6097 = vmatmul.mubr.msk.bf16.gmra.mrb[32].mxu1 %vm2539_vm3, %v7796_v24 }
 0x1ec   :  { %v2423_v30 = vadd.f32 %v7761_v23, %v2402_v28  ;;  %5940 = vmatprep.mubr.msk.bf16.mxu0 %vm6923_vm2, %v6922_v40  ;;  %5957 = vmatpush3.bf16.msra.mxu0 %v6839_v20 }
 0x1ed   :  { %v5710_v33 = vpop.f32.mrb[16].mxu0  ;;  %v2422_v35 = vadd.f32 %v7761_v23, %v2401_v29  ;;  %v5910_v36 = vpop.f32.mrb[16].mxu1  ;;  %6100 = vmatprep.mubr.msk.bf16.mxu1 %vm6923_vm2, %v6922_v40  ;;  %6117 = vmatpush3.bf16.msra.mxu1 %v6840_v27 }
 0x1ee   :  { %v1238_v37 = vpop.f32.mrb[17].mxu0  ;;  %v2437_v39 = vmax.f32 %v2423_v30, 0.0  ;;  %v2306_v41 = vpop.f32.mrb[17].mxu1  ;;  %5958 = vmatprep.subr.bf16.mxu0 %v6922_v40  ;;  %6118 = vmatprep.subr.bf16.mxu1 %v6922_v40 }
 0x1ef   :  { %v5711_v43 = vpop.f32.mrb[18].mxu0  ;;  %v2436_v44 = vmax.f32 %v2422_v35, 0.0  ;;  %v5911_v47 = vpop.f32.mrb[18].mxu1 }
 0x1f0   :  { %v1322_v45 = vmax.f32 %v5710_v33, %v5711_v43  ;;  %v1241_v48 = vpop.f32.mrb[19].mxu0  ;;  %v2390_v49 = vmax.f32 %v5910_v36, %v5911_v47  ;;  %v2309_v53 = vpop.f32.mrb[19].mxu1  ;;  %5959 = vmatpush3.bf16.msra.mxu0 %v6841_v34 }
 0x1f1   :  { %v1321_v51 = vmax.f32 %v1238_v37, %v1241_v48  ;;  %v7823_v54 = vpack.c.bf16 %v2436_v44, %v2435_v10  ;;  %v7825_v55 = vpack.c.bf16 %v2437_v39, %v2436_v44  ;;  %v2389_v21 = vmax.f32 %v2306_v41, %v2309_v53  ;;  %6119 = vmatpush3.bf16.msra.mxu1 %v6842_v38 }
 0x1f2   :  { %5960 = vmatprep.subr.bf16.mxu0 %v6922_v40  ;;  %v2404_v31 = vmax.f32 %v1322_v45, %v2390_v49  ;;  %6120 = vmatprep.subr.bf16.mxu1 %v6922_v40  ;;  %v6847_v49 = vld [vmem:[%s8394_s3 + $0x58] sm:$0xff]  }
 0x1f3   :  { %v2403_v60 = vmax.f32 %v1321_v51, %v2389_v21  ;;  %5941 = vmatmul.mubr.msk.bf16.gmra.mrb[36].mxu0 %vm2539_vm3, %v7823_v54  ;;  %6101 = vmatmul.mubr.msk.bf16.gmra.mrb[36].mxu1 %vm2539_vm3, %v7823_v54  ;;  %v6848_v51 = vld [vmem:[%s8394_s3 + $0x134] sm:$0xff]  }
 0x1f4   :  { %v2425_v42 = vadd.f32 %v7761_v23, %v2404_v31  ;;  %5944 = vmatprep.mubr.msk.bf16.mxu0 %vm6923_vm2, %v6922_v40  ;;  %6104 = vmatprep.mubr.msk.bf16.mxu1 %vm6923_vm2, %v6922_v40  ;;  %v6853_v31 = vld [vmem:[%s8394_s3 + $0x70] sm:$0xff]  }
 0x1f5   :  { %v5714_v50 = vpop.f32.mrb[20].mxu0  ;;  %v2424_v52 = vadd.f32 %v7761_v23, %v2403_v60  ;;  %v5914_v57 = vpop.f32.mrb[20].mxu1  ;;  %5961 = vmatpush3.bf16.msra.mxu0 %v6843_v56  ;;  %6121 = vmatpush3.bf16.msra.mxu1 %v6844_v22  ;;  %v6850_v56 = vld [vmem:[%s8394_s3 + $0x13c] sm:$0xff]   ;;  %v6852_v22 = vld [vmem:[%s8394_s3 + $0x144] sm:$0xff]   ;;  %v6856_v60 = vld [vmem:[%s8394_s3 + $0x154] sm:$0xff]  }
 0x1f6   :  { %v1254_v58 = vpop.f32.mrb[21].mxu0  ;;  %v2439_v61 = vmax.f32 %v2425_v42, 0.0  ;;  %v2322_v62 = vpop.f32.mrb[21].mxu1  ;;  %5962 = vmatprep.subr.bf16.mxu0 %v6922_v40  ;;  %6122 = vmatprep.subr.bf16.mxu1 %v6922_v40  ;;  %v6857_v42 = vld [vmem:[%s8394_s3 + $0x80] ss:$0 sps:$4 sm:$0x33]  }
 0x1f7   :  { %v5715_v0 = vpop.f32.mrb[22].mxu0  ;;  %v2438_v3 = vmax.f32 %v2424_v52, 0.0  ;;  %v5915_v5 = vpop.f32.mrb[22].mxu1  ;;  %v2815_v52 = vsel %vm2555_vm1, %v6857_v42, 0 }
 0x1f8   :  { %v1324_v4 = vmax.f32 %v5714_v50, %v5715_v0  ;;  %v1257_v6 = vpop.f32.mrb[23].mxu0  ;;  %v2392_v7 = vmax.f32 %v5914_v57, %v5915_v5  ;;  %v2325_v9 = vpop.f32.mrb[23].mxu1  ;;  %v6858_v50 = vld [vmem:[%s8394_s3 + $0x15c] ss:$0 sps:$4 sm:$0x33]   ;;  %v6862_v0 = vld [vmem:[%s8394_s3 + $0x168] sm:$0xff]  }
 0x1f9   :  { %v1323_v8 = vmax.f32 %v1254_v58, %v1257_v6  ;;  %v7855_v10 = vpack.c.bf16 %v2438_v3, %v2437_v39  ;;  %v7857_v11 = vpack.c.bf16 %v2439_v61, %v2438_v3  ;;  %v2391_v12 = vmax.f32 %v2322_v62, %v2325_v9  ;;  %5963 = vmatpush3.bf16.msra.mxu0 %v2688_v1  ;;  %v6859_v58 = vld [vmem:[%s8394_s3 + $0x84] sm:$0xff]   ;;  %v6861_v62 = vld [vmem:[%s8394_s3 + $0x8c] sm:$0xff]   ;;  %v6863_v1 = vld [vmem:[%s8394_s3 + $0x94] sm:$0xff]  }
 0x1fa   :  { %6123 = vmatpush3.bf16.msra.mxu1 %v3346_v2  ;;  %v2406_v13 = vmax.f32 %v1324_v4, %v2392_v7  ;;  %5984 = vmatprep.subr.bf16.mxu0 %v6922_v40  ;;  %v3467_v57 = vsel %vm2555_vm1, %v6858_v50, 0  ;;  %v6865_v2 = vld [vmem:[%s8394_s3 + $0x9c] sm:$0xff]   ;;  %v6867_v4 = vld [vmem:[%s8394_s3 + $0xa4] sm:$0xff]   ;;  %v6869_v6 = vld [vmem:[%s8394_s3 + $0xac] ss:$0 sps:$4 sm:$0x33]  }
 0x1fb   :  { %6144 = vmatprep.subr.bf16.mxu1 %v6922_v40  ;;  %v2405_v14 = vmax.f32 %v1323_v8, %v2391_v12  ;;  %5945 = vmatmul.mubr.msk.bf16.gmra.mrb[40].mxu0 %vm2539_vm3, %v7855_v10  ;;  %v6866_v3 = vld [vmem:[%s8394_s3 + $0x178] sm:$0xff]   ;;  %v6868_v5 = vld [vmem:[%s8394_s3 + $0x180] sm:$0xff]   ;;  %v6870_v7 = vld [vmem:[%s8394_s3 + $0x188] ss:$0 sps:$4 sm:$0x33]   ;;  %v2952_v8 = vsel %vm2555_vm1, %v6869_v6, 0 }
 0x1fc   :  { %6105 = vmatmul.mubr.msk.bf16.gmra.mrb[40].mxu1 %vm2539_vm3, %v7855_v10  ;;  %v2427_v15 = vadd.f32 %v7761_v23, %v2406_v13  ;;  %5948 = vmatprep.mubr.msk.bf16.mxu0 %vm6923_vm2, %v6922_v40  ;;  %v3598_v9 = vsel %vm2555_vm1, %v6870_v7, 0  ;;  %v6871_v12 = vld [vmem:[%s8394_s3 + $0xb0] sm:$0xff]  }
 0x1fd   :  { %v5718_v16 = vpop.f32.mrb[24].mxu0  ;;  %6108 = vmatprep.mubr.msk.bf16.mxu1 %vm6923_vm2, %v6922_v40  ;;  %v2426_v17 = vadd.f32 %v7761_v23, %v2405_v14  ;;  %v5918_v18 = vpop.f32.mrb[24].mxu1  ;;  %v6872_v13 = vld [vmem:[%s8394_s3 + $0x18c] sm:$0xff]   ;;  %v6873_v14 = vld [vmem:[%s8394_s3 + $0xb8] sm:$0xff]  }
 0x1fe   :  { %v1270_v19 = vpop.f32.mrb[25].mxu0  ;;  %v2441_v20 = vmax.f32 %v2427_v15, 0.0  ;;  %v2338_v26 = vpop.f32.mrb[25].mxu1  ;;  %v6874_v15 = vld [vmem:[%s8394_s3 + $0x194] sm:$0xff]  }
 0x1ff   :  { %v5719_v27 = vpop.f32.mrb[26].mxu0  ;;  %v2440_v28 = vmax.f32 %v2426_v17, 0.0  ;;  %v5919_v30 = vpop.f32.mrb[26].mxu1  ;;  %v6877_v17 = vld [vmem:[%s8394_s3 + $0xc8] sm:$0xff]   ;;  %v6894_v7 = vld [vmem:[%s8396_s5 + $0x50] sm:$0xff]  }
 0x200   :  { %v1326_v29 = vmax.f32 %v5718_v16, %v5719_v27  ;;  %v1273_v33 = vpop.f32.mrb[27].mxu0  ;;  %v2394_v34 = vmax.f32 %v5918_v18, %v5919_v30  ;;  %v2341_v36 = vpop.f32.mrb[27].mxu1  ;;  %v6876_v16 = vld [vmem:[%s8394_s3 + $0x19c] sm:$0xff]   ;;  %v6878_v18 = vld [vmem:[%s8394_s3 + $0x1a4] sm:$0xff]   ;;  %v6884_v30 = vld [vmem:[%s8396_s5 + $0x30] sm:$0xff]  }
 0x201   :  { %v1325_v35 = vmax.f32 %v1270_v19, %v1273_v33  ;;  %v7871_v37 = vpack.c.bf16 %v2440_v28, %v2439_v61  ;;  %v7873_v38 = vpack.c.bf16 %v2441_v20, %v2440_v28  ;;  %v2393_v39 = vmax.f32 %v2338_v26, %v2341_v36  ;;  %v6860_v61 = vld [vmem:[%s8394_s3 + $0x160] sm:$0xff]   ;;  %v6880_v19 = vld [vmem:[%s8394_s3 + $0x1ac] sm:$0xff]   ;;  %v6882_v26 = vld [vmem:[%s8394_s3 + $0x1b4] ss:$0 sps:$4 sm:$0x33]  }
 0x202   :  { %v2408_v41 = vmax.f32 %v1326_v29, %v2394_v34  ;;  %v3729_v28 = vsel %vm2555_vm1, %v6882_v26, 0  ;;  %v6885_v29 = vld [vmem:[%s8396_s5] sm:$0xff]   ;;  %v6887_v33 = vld [vmem:[%s8396_s5 + $0x8] sm:$0xff]  }
 0x203   :  { %v2407_v43 = vmax.f32 %v1325_v35, %v2393_v39  ;;  %5949 = vmatmul.mubr.msk.bf16.gmra.mrb[44].mxu0 %vm2539_vm3, %v7871_v37  ;;  %v6891_v34 = vld [vmem:[%s8396_s5 + $0x20] sm:$0xff]   ;;  %v6892_v36 = vld [vmem:[%s8396_s5 + $0x48] sm:$0xff]  }
 0x204   :  { %6109 = vmatmul.mubr.msk.bf16.gmra.mrb[44].mxu1 %vm2539_vm3, %v7871_v37  ;;  %v2429_v44 = vadd.f32 %v7761_v23, %v2408_v41  ;;  %5964 = vmatprep.mubr.msk.bf16.mxu0 %vm6923_vm2, %v6922_v40  ;;  %v6889_v35 = vld [vmem:[%s8396_s5 + $0x40] sm:$0xff]  }
 0x205   :  { %6124 = vmatprep.mubr.msk.bf16.mxu1 %vm6923_vm2, %v6922_v40  ;;  %v2428_v45 = vadd.f32 %v7761_v23, %v2407_v43  ;;  %v6849_v23 = vld [vmem:[%s8394_s3 + $0x60] sm:$0xff]  }
 0x206   :  { %v2443_v47 = vmax.f32 %v2429_v44, 0.0 }
 0x207   :  { %v2442_v48 = vmax.f32 %v2428_v45, 0.0 }
 0x209   :  { %v7891_v53 = vpack.c.bf16 %v2442_v48, %v2441_v20  ;;  %v7893_v21 = vpack.c.bf16 %v2443_v47, %v2442_v48  ;;  %v6881_v20 = vld [vmem:[%s8394_s3 + $0xd8] ss:$0 sps:$4 sm:$0x33]  }
 0x20a   :  { %v3089_v27 = vsel %vm2555_vm1, %v6881_v20, 0 }
 0x20b   :  { %5965 = vmatmul.mubr.msk.bf16.vlgmr.msra.gmra.mrb[28].mxu0 %vm2539_vm3, %v7765_v46 }
 0x20c   :  { %6125 = vmatmul.mubr.msk.bf16.vlgmr.msra.gmra.mrb[28].mxu1 %vm2539_vm3, %v7765_v46  ;;  %5985 = vmatpush3.bf16.msra.mxu0 %v6847_v49  ;;  %v6851_v46 = vld [vmem:[%s8394_s3 + $0x68] sm:$0xff]  }
 0x20d   :  { %6145 = vmatpush3.bf16.msra.mxu1 %v6848_v51  ;;  %5968 = vmatprep.mubr.msk.bf16.mxu0 %vm6923_vm2, %v6922_v40  ;;  %v8242_v51 = vld [vmem:[%s8397_s4] ss:$0 sm:$0xff] }
 0x20e   :  { %5986 = vmatprep.subr.bf16.mxu0 %v6922_v40  ;;  %6128 = vmatprep.mubr.msk.bf16.mxu1 %vm6923_vm2, %v6922_v40 }
 0x20f   :  { %6146 = vmatprep.subr.bf16.mxu1 %v6922_v40 }
 0x210   :  { %5987 = vmatpush3.bf16.msra.mxu0 %v6849_v23 }
 0x211   :  { %6147 = vmatpush3.bf16.msra.mxu1 %v6850_v56  ;;  %5988 = vmatprep.subr.bf16.mxu0 %v6922_v40 }
 0x212   :  { %6148 = vmatprep.subr.bf16.mxu1 %v6922_v40 }
 0x213   :  { %5969 = vmatmul.mubr.msk.bf16.gmra.mrb[32].mxu0 %vm2539_vm3, %v7775_v63 }
 0x214   :  { %6129 = vmatmul.mubr.msk.bf16.gmra.mrb[32].mxu1 %vm2539_vm3, %v7775_v63  ;;  %5972 = vmatprep.mubr.msk.bf16.mxu0 %vm6923_vm2, %v6922_v40 }
 0x215   :  { %5989 = vmatpush3.bf16.msra.mxu0 %v6851_v46  ;;  %6132 = vmatprep.mubr.msk.bf16.mxu1 %vm6923_vm2, %v6922_v40 }
 0x216   :  { %6149 = vmatpush3.bf16.msra.mxu1 %v6852_v22  ;;  %5990 = vmatprep.subr.bf16.mxu0 %v6922_v40 }
 0x217   :  { %6150 = vmatprep.subr.bf16.mxu1 %v6922_v40 }
 0x219   :  { %5991 = vmatpush3.bf16.msra.mxu0 %v6853_v31 }
 0x21a   :  { %6151 = vmatpush3.bf16.msra.mxu1 %v6854_v59  ;;  %5992 = vmatprep.subr.bf16.mxu0 %v6922_v40 }
 0x21b   :  { %6152 = vmatprep.subr.bf16.mxu1 %v6922_v40  ;;  %5973 = vmatmul.mubr.msk.bf16.gmra.mrb[36].mxu0 %vm2539_vm3, %v7798_v25 }
 0x21c   :  { %6133 = vmatmul.mubr.msk.bf16.gmra.mrb[36].mxu1 %vm2539_vm3, %v7798_v25  ;;  %5976 = vmatprep.mubr.msk.bf16.mxu0 %vm6923_vm2, %v6922_v40 }
 0x21d   :  { %6136 = vmatprep.mubr.msk.bf16.mxu1 %vm6923_vm2, %v6922_v40  ;;  %5993 = vmatpush3.bf16.msra.mxu0 %v6855_v32 }
 0x21e   :  { %6153 = vmatpush3.bf16.msra.mxu1 %v6856_v60  ;;  %5994 = vmatprep.subr.bf16.mxu0 %v6922_v40  ;;  %v6893_v60 = vld [vmem:[%s8396_s5 + $0x78] sm:$0xff]  }
 0x21f   :  { %6154 = vmatprep.subr.bf16.mxu1 %v6922_v40 }
 0x221   :  { %5995 = vmatpush3.bf16.msra.mxu0 %v2815_v52 }
 0x222   :  { %6155 = vmatpush3.bf16.msra.mxu1 %v3467_v57  ;;  %6016 = vmatprep.subr.bf16.mxu0 %v6922_v40 }
 0x223   :  { %6176 = vmatprep.subr.bf16.mxu1 %v6922_v40  ;;  %5977 = vmatmul.mubr.msk.bf16.gmra.mrb[40].mxu0 %vm2539_vm3, %v7825_v55 }
 0x224   :  { %6137 = vmatmul.mubr.msk.bf16.gmra.mrb[40].mxu1 %vm2539_vm3, %v7825_v55  ;;  %5980 = vmatprep.mubr.msk.bf16.mxu0 %vm6923_vm2, %v6922_v40 }
 0x225   :  { %6140 = vmatprep.mubr.msk.bf16.mxu1 %vm6923_vm2, %v6922_v40 }
 0x22b   :  { %5981 = vmatmul.mubr.msk.bf16.gmra.mrb[44].mxu0 %vm2539_vm3, %v7857_v11 }
 0x22c   :  { %6141 = vmatmul.mubr.msk.bf16.gmra.mrb[44].mxu1 %vm2539_vm3, %v7857_v11  ;;  %5996 = vmatprep.mubr.msk.bf16.mxu0 %vm6923_vm2, %v6922_v40 }
 0x22d   :  { %6156 = vmatprep.mubr.msk.bf16.mxu1 %vm6923_vm2, %v6922_v40 }
 0x233   :  { %5997 = vmatmul.mubr.msk.bf16.vlgmr.msra.gmra.mrb[28].mxu0 %vm2539_vm3, %v7775_v63 }
 0x234   :  { %6157 = vmatmul.mubr.msk.bf16.vlgmr.msra.gmra.mrb[28].mxu1 %vm2539_vm3, %v7775_v63  ;;  %6017 = vmatpush3.bf16.msra.mxu0 %v6859_v58  ;;  %v6864_v63 = vld [vmem:[%s8394_s3 + $0x170] sm:$0xff]  }
 0x235   :  { %6177 = vmatpush3.bf16.msra.mxu1 %v6860_v61  ;;  %6000 = vmatprep.mubr.msk.bf16.mxu0 %vm6923_vm2, %v6922_v40 }
 0x236   :  { %6018 = vmatprep.subr.bf16.mxu0 %v6922_v40  ;;  %6160 = vmatprep.mubr.msk.bf16.mxu1 %vm6923_vm2, %v6922_v40 }
 0x237   :  { %6178 = vmatprep.subr.bf16.mxu1 %v6922_v40 }
 0x238   :  { %6019 = vmatpush3.bf16.msra.mxu0 %v6861_v62  ;;  %v6895_v62 = vld [vmem:[%s8396_s5 + $0x80] sm:$0xff]  }
 0x239   :  { %6179 = vmatpush3.bf16.msra.mxu1 %v6862_v0  ;;  %6020 = vmatprep.subr.bf16.mxu0 %v6922_v40 }
 0x23a   :  { %6180 = vmatprep.subr.bf16.mxu1 %v6922_v40 }
 0x23b   :  { %6001 = vmatmul.mubr.msk.bf16.gmra.mrb[32].mxu0 %vm2539_vm3, %v7798_v25 }
 0x23c   :  { %6161 = vmatmul.mubr.msk.bf16.gmra.mrb[32].mxu1 %vm2539_vm3, %v7798_v25  ;;  %6004 = vmatprep.mubr.msk.bf16.mxu0 %vm6923_vm2, %v6922_v40 }
 0x23d   :  { %6021 = vmatpush3.bf16.msra.mxu0 %v6863_v1  ;;  %6164 = vmatprep.mubr.msk.bf16.mxu1 %vm6923_vm2, %v6922_v40 }
 0x23e   :  { %6181 = vmatpush3.bf16.msra.mxu1 %v6864_v63  ;;  %6022 = vmatprep.subr.bf16.mxu0 %v6922_v40 }
 0x23f   :  { %6182 = vmatprep.subr.bf16.mxu1 %v6922_v40 }
 0x241   :  { %6023 = vmatpush3.bf16.msra.mxu0 %v6865_v2 }
 0x242   :  { %6183 = vmatpush3.bf16.msra.mxu1 %v6866_v3  ;;  %6024 = vmatprep.subr.bf16.mxu0 %v6922_v40 }
 0x243   :  { %6184 = vmatprep.subr.bf16.mxu1 %v6922_v40  ;;  %6005 = vmatmul.mubr.msk.bf16.gmra.mrb[36].mxu0 %vm2539_vm3, %v7825_v55 }
 0x244   :  { %6165 = vmatmul.mubr.msk.bf16.gmra.mrb[36].mxu1 %vm2539_vm3, %v7825_v55  ;;  %6008 = vmatprep.mubr.msk.bf16.mxu0 %vm6923_vm2, %v6922_v40 }
 0x245   :  { %6168 = vmatprep.mubr.msk.bf16.mxu1 %vm6923_vm2, %v6922_v40  ;;  %6025 = vmatpush3.bf16.msra.mxu0 %v6867_v4 }
 0x246   :  { %6185 = vmatpush3.bf16.msra.mxu1 %v6868_v5  ;;  %6026 = vmatprep.subr.bf16.mxu0 %v6922_v40 }
 0x247   :  { %6186 = vmatprep.subr.bf16.mxu1 %v6922_v40 }
 0x249   :  { %6027 = vmatpush3.bf16.msra.mxu0 %v2952_v8  ;;  %v6897_v8 = vld [vmem:[%s8396_s5 + $0x88] sm:$0xff]  }
 0x24a   :  { %6187 = vmatpush3.bf16.msra.mxu1 %v3598_v9  ;;  %6048 = vmatprep.subr.bf16.mxu0 %v6922_v40 }
 0x24b   :  { %6208 = vmatprep.subr.bf16.mxu1 %v6922_v40  ;;  %6009 = vmatmul.mubr.msk.bf16.gmra.mrb[40].mxu0 %vm2539_vm3, %v7857_v11 }
 0x24c   :  { %6169 = vmatmul.mubr.msk.bf16.gmra.mrb[40].mxu1 %vm2539_vm3, %v7857_v11  ;;  %6012 = vmatprep.mubr.msk.bf16.mxu0 %vm6923_vm2, %v6922_v40 }
 0x24d   :  { %6172 = vmatprep.mubr.msk.bf16.mxu1 %vm6923_vm2, %v6922_v40 }
 0x253   :  { %6013 = vmatmul.mubr.msk.bf16.gmra.mrb[44].mxu0 %vm2539_vm3, %v7873_v38 }
 0x254   :  { %6173 = vmatmul.mubr.msk.bf16.gmra.mrb[44].mxu1 %vm2539_vm3, %v7873_v38  ;;  %6028 = vmatprep.mubr.msk.bf16.mxu0 %vm6923_vm2, %v6922_v40 }
 0x255   :  { %6188 = vmatprep.mubr.msk.bf16.mxu1 %vm6923_vm2, %v6922_v40 }
 0x25b   :  { %6029 = vmatmul.mubr.msk.bf16.vlgmr.msra.gmra.mrb[28].mxu0 %vm2539_vm3, %v7796_v24 }
 0x25c   :  { %6189 = vmatmul.mubr.msk.bf16.vlgmr.msra.gmra.mrb[28].mxu1 %vm2539_vm3, %v7796_v24  ;;  %6049 = vmatpush3.bf16.msra.mxu0 %v6871_v12  ;;  %v6875_v24 = vld [vmem:[%s8394_s3 + $0xc0] sm:$0xff]  }
 0x25d   :  { %6209 = vmatpush3.bf16.msra.mxu1 %v6872_v13  ;;  %6032 = vmatprep.mubr.msk.bf16.mxu0 %vm6923_vm2, %v6922_v40 }
 0x25e   :  { %6050 = vmatprep.subr.bf16.mxu0 %v6922_v40  ;;  %6192 = vmatprep.mubr.msk.bf16.mxu1 %vm6923_vm2, %v6922_v40 }
 0x25f   :  { %6210 = vmatprep.subr.bf16.mxu1 %v6922_v40 }
 0x260   :  { %6051 = vmatpush3.bf16.msra.mxu0 %v6873_v14 }
 0x261   :  { %6211 = vmatpush3.bf16.msra.mxu1 %v6874_v15  ;;  %6052 = vmatprep.subr.bf16.mxu0 %v6922_v40 }
 0x262   :  { %6212 = vmatprep.subr.bf16.mxu1 %v6922_v40 }
 0x263   :  { %6033 = vmatmul.mubr.msk.bf16.gmra.mrb[32].mxu0 %vm2539_vm3, %v7823_v54 }
 0x264   :  { %6193 = vmatmul.mubr.msk.bf16.gmra.mrb[32].mxu1 %vm2539_vm3, %v7823_v54  ;;  %6036 = vmatprep.mubr.msk.bf16.mxu0 %vm6923_vm2, %v6922_v40  ;;  %v6879_v54 = vld [vmem:[%s8394_s3 + $0xd0] sm:$0xff]  }
 0x265   :  { %6053 = vmatpush3.bf16.msra.mxu0 %v6875_v24  ;;  %6196 = vmatprep.mubr.msk.bf16.mxu1 %vm6923_vm2, %v6922_v40 }
 0x266   :  { %6213 = vmatpush3.bf16.msra.mxu1 %v6876_v16  ;;  %6054 = vmatprep.subr.bf16.mxu0 %v6922_v40  ;;  %v6896_v16 = vld [vmem:[%s8396_s5 + $0x58] sm:$0xff]  }
 0x267   :  { %6214 = vmatprep.subr.bf16.mxu1 %v6922_v40 }
 0x269   :  { %6055 = vmatpush3.bf16.msra.mxu0 %v6877_v17  ;;  %v6899_v17 = vld [vmem:[%s8396_s5 + $0x90] sm:$0xff]  }
 0x26a   :  { %6215 = vmatpush3.bf16.msra.mxu1 %v6878_v18  ;;  %6056 = vmatprep.subr.bf16.mxu0 %v6922_v40 }
 0x26b   :  { %6216 = vmatprep.subr.bf16.mxu1 %v6922_v40  ;;  %6037 = vmatmul.mubr.msk.bf16.gmra.mrb[36].mxu0 %vm2539_vm3, %v7855_v10 }
 0x26c   :  { %6197 = vmatmul.mubr.msk.bf16.gmra.mrb[36].mxu1 %vm2539_vm3, %v7855_v10  ;;  %6040 = vmatprep.mubr.msk.bf16.mxu0 %vm6923_vm2, %v6922_v40  ;;  %v6883_v10 = vld [vmem:[%s8396_s5 + $0x28] sm:$0xff]  }
 0x26d   :  { %6200 = vmatprep.mubr.msk.bf16.mxu1 %vm6923_vm2, %v6922_v40  ;;  %6057 = vmatpush3.bf16.msra.mxu0 %v6879_v54 }
 0x26e   :  { %6217 = vmatpush3.bf16.msra.mxu1 %v6880_v19  ;;  %6058 = vmatprep.subr.bf16.mxu0 %v6922_v40 }
 0x26f   :  { %6218 = vmatprep.subr.bf16.mxu1 %v6922_v40 }
 0x271   :  { %6059 = vmatpush3.bf16.msra.mxu0 %v3089_v27 }
 0x272   :  { %6219 = vmatpush3.bf16.msra.mxu1 %v3729_v28  ;;  %6240 = vmatprep.subr.bf16.mxu0 %v6922_v40  ;;  %v6898_v28 = vld [vmem:[%s8396_s5 + $0x60] sm:$0xff]  }
 0x273   :  { %6254 = vmatprep.subr.bf16.mxu1 %v6922_v40  ;;  %6041 = vmatmul.mubr.msk.bf16.gmra.mrb[40].mxu0 %vm2539_vm3, %v7871_v37 }
 0x274   :  { %6201 = vmatmul.mubr.msk.bf16.gmra.mrb[40].mxu1 %vm2539_vm3, %v7871_v37  ;;  %6044 = vmatprep.mubr.msk.bf16.mxu0 %vm6923_vm2, %v6922_v40 }
 0x275   :  { %6204 = vmatprep.mubr.msk.bf16.mxu1 %vm6923_vm2, %v6922_v40 }
 0x27b   :  { %6045 = vmatmul.mubr.msk.bf16.gmra.mrb[44].mxu0 %vm2539_vm3, %v7891_v53 }
 0x27c   :  { %6205 = vmatmul.mubr.msk.bf16.gmra.mrb[44].mxu1 %vm2539_vm3, %v7891_v53  ;;  %6060 = vmatprep.mubr.msk.bf16.mxu0 %vm6923_vm2, %v6922_v40 }
 0x27d   :  { %6220 = vmatprep.mubr.msk.bf16.mxu1 %vm6923_vm2, %v6922_v40 }
 0x283   :  { %6061 = vmatmul.mubr.msk.bf16.vlgmr.msra.gmra.mrb[28].mxu0 %vm2539_vm3, %v7798_v25 }
 0x284   :  { %6221 = vmatmul.mubr.msk.bf16.vlgmr.msra.gmra.mrb[28].mxu1 %vm2539_vm3, %v7798_v25  ;;  %6064 = vmatprep.mubr.msk.bf16.mxu0 %vm6923_vm2, %v6922_v40  ;;  %v6886_v25 = vld [vmem:[%s8396_s5 + $0x38] sm:$0xff]  }
 0x285   :  { %6224 = vmatprep.mubr.msk.bf16.mxu1 %vm6923_vm2, %v6922_v40  ;;  %6241 = vmatpush3.bf16.msra.mxu0 %v6883_v10  ;;  %v6901_v10 = vld [vmem:[%s8396_s5 + $0x98] sm:$0xff]  }
 0x286   :  { %6255 = vmatpush3.bf16.msra.mxu1 %v6885_v29  ;;  %6242 = vmatprep.subr.bf16.mxu0 %v6922_v40 }
 0x287   :  { %6256 = vmatprep.subr.bf16.mxu1 %v6922_v40 }
 0x289   :  { %6243 = vmatpush3.bf16.msra.mxu0 %v6884_v30 }
 0x28a   :  { %6257 = vmatpush3.bf16.msra.mxu1 %v6887_v33  ;;  %6244 = vmatprep.subr.bf16.mxu0 %v6922_v40 }
 0x28b   :  { %6258 = vmatprep.subr.bf16.mxu1 %v6922_v40  ;;  %6065 = vmatmul.mubr.msk.bf16.gmra.mrb[32].mxu0 %vm2539_vm3, %v7825_v55 }
 0x28c   :  { %6225 = vmatmul.mubr.msk.bf16.gmra.mrb[32].mxu1 %vm2539_vm3, %v7825_v55  ;;  %6068 = vmatprep.mubr.msk.bf16.mxu0 %vm6923_vm2, %v6922_v40  ;;  %v6888_v55 = vld [vmem:[%s8396_s5 + $0x10] sm:$0xff]  }
 0x28d   :  { %6228 = vmatprep.mubr.msk.bf16.mxu1 %vm6923_vm2, %v6922_v40  ;;  %6245 = vmatpush3.bf16.msra.mxu0 %v6886_v25 }
 0x28e   :  { %6246 = vmatprep.subr.bf16.mxu0 %v6922_v40  ;;  %6259 = vmatpush3.bf16.msra.mxu1 %v6888_v55 }
 0x28f   :  { %6260 = vmatprep.subr.bf16.mxu1 %v6922_v40 }
 0x291   :  { %6247 = vmatpush3.bf16.msra.mxu0 %v6889_v35 }
 0x292   :  { %6248 = vmatprep.subr.bf16.mxu0 %v6922_v40 }
 0x293   :  { %6069 = vmatmul.mubr.msk.bf16.gmra.mrb[36].mxu0 %vm2539_vm3, %v7857_v11 }
 0x294   :  { %6229 = vmatmul.mubr.msk.bf16.gmra.mrb[36].mxu1 %vm2539_vm3, %v7857_v11  ;;  %6072 = vmatprep.mubr.msk.bf16.mxu0 %vm6923_vm2, %v6922_v40  ;;  %v6890_v11 = vld [vmem:[%s8396_s5 + $0x18] sm:$0xff]  }
 0x295   :  { %6232 = vmatprep.mubr.msk.bf16.mxu1 %vm6923_vm2, %v6922_v40  ;;  %6261 = vmatpush3.bf16.msra.mxu1 %v6890_v11  ;;  %v6900_v11 = vld [vmem:[%s8396_s5 + $0x68] sm:$0xff]  }
 0x296   :  { %6262 = vmatprep.subr.bf16.mxu1 %v6922_v40  ;;  %6249 = vmatpush3.bf16.msra.mxu0 %v6892_v36 }
 0x297   :  { %6268 = vmatprep.subr.bf16.mxu0 %v6922_v40 }
 0x299   :  { %6263 = vmatpush3.bf16.msra.mxu1 %v6891_v34 }
 0x29a   :  { %6282 = vmatprep.subr.bf16.mxu1 %v6922_v40 }
 0x29b   :  { %6073 = vmatmul.mubr.msk.bf16.gmra.mrb[40].mxu0 %vm2539_vm3, %v7873_v38 }
 0x29c   :  { %6233 = vmatmul.mubr.msk.bf16.gmra.mrb[40].mxu1 %vm2539_vm3, %v7873_v38  ;;  %6076 = vmatprep.mubr.msk.bf16.mxu0 %vm6923_vm2, %v6922_v40 }
 0x29d   :  { %6236 = vmatprep.mubr.msk.bf16.mxu1 %vm6923_vm2, %v6922_v40 }
 0x2a3   :  { %6077 = vmatmul.mubr.msk.bf16.gmra.mrb[44].mxu0 %vm2539_vm3, %v7893_v21 }
 0x2a4   :  { %6237 = vmatmul.mubr.msk.bf16.gmra.mrb[44].mxu1 %vm2539_vm3, %v7893_v21  ;;  %6250 = vmatprep.mubr.msk.bf16.mxu0 %vm6923_vm2, %v6922_v40 }
 0x2a5   :  { %6264 = vmatprep.mubr.msk.bf16.mxu1 %vm6923_vm2, %v6922_v40 }
 0x356   :  { %v3125_v37 = vpop.f32.mrb[28].mxu0 }
 0x357   :  { %v3765_v38 = vpop.f32.mrb[28].mxu1  ;;  %v6062_v39 = vpop.f32.mrb[29].mxu0 }
 0x358   :  { %v6222_v41 = vpop.f32.mrb[29].mxu1  ;;  %v3128_v43 = vpop.f32.mrb[30].mxu0 }
 0x359   :  { %v3768_v44 = vpop.f32.mrb[30].mxu1  ;;  %v3174_v45 = vmax.f32 %v3125_v37, %v3128_v43  ;;  %v6063_v48 = vpop.f32.mrb[31].mxu0 }
 0x35a   :  { %v3814_v47 = vmax.f32 %v3765_v38, %v3768_v44  ;;  %v6223_v49 = vpop.f32.mrb[31].mxu1 }
 0x35c   :  { %v3819_v53 = vmax.f32 %v3174_v45, %v3814_v47  ;;  %v6902_v45 = vld [vmem:[%s8396_s5 + $0x70] sm:$0xff]  }
 0x35e   :  { %v3831_v21 = vadd.f32 %v8242_v51, %v3819_v53  ;;  %v3133_v23 = vpop.f32.mrb[32].mxu0 }
 0x35f   :  { %v3773_v56 = vpop.f32.mrb[32].mxu1  ;;  %v6066_v22 = vpop.f32.mrb[33].mxu0 }
 0x360   :  { %v3836_v46 = vmax.f32 %v3831_v21, 0.0  ;;  %v6226_v31 = vpop.f32.mrb[33].mxu1  ;;  %v3136_v59 = vpop.f32.mrb[34].mxu0 }
 0x361   :  { %v3776_v32 = vpop.f32.mrb[34].mxu1  ;;  %v3175_v50 = vmax.f32 %v3133_v23, %v3136_v59  ;;  %v6067_v57 = vpop.f32.mrb[35].mxu0  ;;  %v6904_v31 = vld [vmem:[%s8396_s5 + $0xa8] sm:$0xff]   ;;  %v6905_v59 = vld [vmem:[%s8396_s5 + $0xb0] sm:$0xff]  }
 0x362   :  { %v3841_v42 = vpack.c.bf16 %v3836_v46, %v3836_v46  ;;  %v3815_v52 = vmax.f32 %v3773_v56, %v3776_v32  ;;  %v6227_v58 = vpop.f32.mrb[35].mxu1  ;;  %v6903_v46 = vld [vmem:[%s8396_s5 + $0xa0] sm:$0xff]   ;;  %v6906_v32 = vld [vmem:[%s8396_s5 + $0xb8] sm:$0xff]   ;;  %v6909_v57 = vld [vmem:[%s8398_s7 + $0x8] sm:$0xff]  }
 0x363   :  { %v6910_v58 = vld [vmem:[%s8398_s7 + $0x10] sm:$0xff]  }
 0x364   :  { %v3820_v61 = vmax.f32 %v3175_v50, %v3815_v52  ;;  %6265 = vmatmul.mubr.msk.bf16.vlgmr.msra.gmra.mrb[48].mxu1 %vm3897_vm4, %v3841_v42  ;;  %v6907_v42 = vld [vmem:[%s8396_s5 + $0xc0] sm:$0xff]  }
 0x365   :  { %6283 = vmatpush3.bf16.msra.mxu1 %v6893_v60  ;;  %6292 = vmatprep.mubr.msk.bf16.mxu1 %vm6923_vm2, %v6922_v40 }
 0x366   :  { %v3832_v0 = vadd.f32 %v8242_v51, %v3820_v61  ;;  %6284 = vmatprep.subr.bf16.mxu1 %v6922_v40  ;;  %v3141_v1 = vpop.f32.mrb[36].mxu0  ;;  %v6911_v61 = vld [vmem:[%s8398_s7 + $0x18] sm:$0xff]  }
 0x367   :  { %v3781_v63 = vpop.f32.mrb[36].mxu1  ;;  %v6070_v3 = vpop.f32.mrb[37].mxu0 }
 0x368   :  { %v3837_v2 = vmax.f32 %v3832_v0, 0.0  ;;  %v6230_v4 = vpop.f32.mrb[37].mxu1  ;;  %v3144_v5 = vpop.f32.mrb[38].mxu0  ;;  %v6913_v0 = vld [vmem:[%s8398_s7 + $0x28] sm:$0xff]   ;;  %v6916_v3 = vld [vmem:[%s8399_s9] sm:$0xff]  }
 0x369   :  { %v3784_v6 = vpop.f32.mrb[38].mxu1  ;;  %6285 = vmatpush3.bf16.msra.mxu1 %v6895_v62  ;;  %v3176_v12 = vmax.f32 %v3141_v1, %v3144_v5  ;;  %v6071_v14 = vpop.f32.mrb[39].mxu0  ;;  %v6912_v62 = vld [vmem:[%s8398_s7 + $0x20] sm:$0xff]   ;;  %v6914_v1 = vld [vmem:[%s8398_s7 + $0x30] sm:$0xff]   ;;  %v6917_v4 = vld [vmem:[%s8399_s9 + $0x8] sm:$0xff]  }
 0x36a   :  { %v3842_v9 = vpack.c.bf16 %v3837_v2, %v3837_v2  ;;  %v3816_v13 = vmax.f32 %v3781_v63, %v3784_v6  ;;  %v6231_v15 = vpop.f32.mrb[39].mxu1  ;;  %6286 = vmatprep.subr.bf16.mxu1 %v6922_v40  ;;  %v6915_v63 = vld [vmem:[%s8398_s7 + $0x38] ss:$0 sps:$4 sm:$0xff]   ;;  %v6918_v5 = vld [vmem:[%s8399_s9 + $0x10] sm:$0xff]  }
 0x36b   :  { %v4352_v2 = vsel %vm4350_vm5, %v6915_v63, 0  ;;  %v6919_v6 = vld [vmem:[%s8399_s9 + $0x18] sm:$0xff]  }
 0x36c   :  { %v3821_v24 = vmax.f32 %v3176_v12, %v3816_v13  ;;  %6251 = vmatmul.mubr.msk.bf16.vlgmr.msra.gmra.mrb[48].mxu0 %vm3897_vm4, %v3842_v9 }
 0x36d   :  { %6269 = vmatpush3.bf16.msra.mxu0 %v6894_v7  ;;  %6287 = vmatpush3.bf16.msra.mxu1 %v6897_v8 }
 0x36e   :  { %6270 = vmatprep.subr.bf16.mxu0 %v6922_v40  ;;  %6288 = vmatprep.subr.bf16.mxu1 %v6922_v40  ;;  %v3149_v18 = vpop.f32.mrb[40].mxu0  ;;  %v3833_v34 = vadd.f32 %v8242_v51, %v3821_v24 }
 0x36f   :  { %v3789_v54 = vpop.f32.mrb[40].mxu1  ;;  %6278 = vmatprep.mubr.msk.bf16.mxu0 %vm6923_vm2, %v6922_v40  ;;  %v6074_v19 = vpop.f32.mrb[41].mxu0 }
 0x370   :  { %v6234_v20 = vpop.f32.mrb[41].mxu1  ;;  %v3152_v26 = vpop.f32.mrb[42].mxu0  ;;  %v3838_v47 = vmax.f32 %v3833_v34, 0.0 }
 0x371   :  { %6271 = vmatpush3.bf16.msra.mxu0 %v6896_v16  ;;  %v3792_v27 = vpop.f32.mrb[42].mxu1  ;;  %6289 = vmatpush3.bf16.msra.mxu1 %v6899_v17  ;;  %v3177_v29 = vmax.f32 %v3149_v18, %v3152_v26  ;;  %v6075_v33 = vpop.f32.mrb[43].mxu0 }
 0x372   :  { %v3817_v30 = vmax.f32 %v3789_v54, %v3792_v27  ;;  %v6235_v25 = vpop.f32.mrb[43].mxu1  ;;  %6272 = vmatprep.subr.bf16.mxu0 %v6922_v40  ;;  %6290 = vmatprep.subr.bf16.mxu1 %v6922_v40  ;;  %v3843_v22 = vpack.c.bf16 %v3838_v47, %v3838_v47  ;;  %v5132_v33 = vld [vmem:[%s8400_s6] ss:$0 sm:$0xff] }
 0x374   :  { %v3822_v55 = vmax.f32 %v3177_v29, %v3817_v30 }
 0x375   :  { %6273 = vmatpush3.bf16.msra.mxu0 %v6898_v28  ;;  %6291 = vmatpush3.bf16.msra.mxu1 %v6901_v10 }
 0x376   :  { %v3834_v35 = vadd.f32 %v8242_v51, %v3822_v55  ;;  %6274 = vmatprep.subr.bf16.mxu0 %v6922_v40  ;;  %6310 = vmatprep.subr.bf16.mxu1 %v6922_v40  ;;  %v3157_v36 = vpop.f32.mrb[44].mxu0 }
 0x377   :  { %v3797_v37 = vpop.f32.mrb[44].mxu1  ;;  %v6078_v39 = vpop.f32.mrb[45].mxu0 }
 0x378   :  { %v3839_v38 = vmax.f32 %v3834_v35, 0.0  ;;  %v6238_v41 = vpop.f32.mrb[45].mxu1  ;;  %v3160_v43 = vpop.f32.mrb[46].mxu0  ;;  %v6921_v39 = vld [vmem:[%s8399_s9 + $0x28] ss:$0 sps:$4 sm:$0x33]  }
 0x379   :  { %6275 = vmatpush3.bf16.msra.mxu0 %v6900_v11  ;;  %v3800_v44 = vpop.f32.mrb[46].mxu1  ;;  %v3178_v49 = vmax.f32 %v3157_v36, %v3160_v43  ;;  %v6079_v21 = vpop.f32.mrb[47].mxu0  ;;  %v4451_v41 = vsel %vm2555_vm1, %v6921_v39, 0  ;;  %v5133_v43 = vld [vmem:[%s8401_s8] ss:$0 sm:$0xff] }
 0x37a   :  { %v3844_v48 = vpack.c.bf16 %v3839_v38, %v3839_v38  ;;  %v3818_v53 = vmax.f32 %v3797_v37, %v3800_v44  ;;  %v6239_v23 = vpop.f32.mrb[47].mxu1  ;;  %6276 = vmatprep.subr.bf16.mxu0 %v6922_v40  ;;  %v6920_v38 = vld [vmem:[%s8399_s9 + $0x20] sm:$0xff]  }
 0x37c   :  { %v3823_v56 = vmax.f32 %v3178_v49, %v3818_v53  ;;  %6293 = vmatmul.mubr.msk.bf16.vlgmr.msra.gmra.mrb[52].mxu1 %vm3897_vm4, %v3844_v48 }
 0x37d   :  { %6277 = vmatpush3.bf16.msra.mxu0 %v6902_v45  ;;  %6326 = vmatprep.mubr.msk.bf16.mxu1 %vm6923_vm2, %v6922_v40 }
 0x37e   :  { %6296 = vmatprep.subr.bf16.mxu0 %v6922_v40  ;;  %v3835_v60 = vadd.f32 %v8242_v51, %v3823_v56  ;;  %v6908_v51 = vld [vmem:[%s8398_s7] sm:$0xff]  }
 0x37f   :  { %6311 = vmatpush3.bf16.msra.mxu1 %v6908_v51 }
 0x380   :  { %6279 = vmatmul.mubr.msk.bf16.vlgmr.msra.gmra.mrb[52].mxu0 %vm3897_vm4, %v3843_v22  ;;  %v3840_v50 = vmax.f32 %v3835_v60, 0.0  ;;  %6312 = vmatprep.subr.bf16.mxu1 %v6922_v40 }
 0x381   :  { %6297 = vmatpush3.bf16.msra.mxu0 %v6903_v46  ;;  %6306 = vmatprep.mubr.msk.bf16.mxu0 %vm6923_vm2, %v6922_v40 }
 0x382   :  { %6298 = vmatprep.subr.bf16.mxu0 %v6922_v40  ;;  %v3845_v52 = vpack.c.bf16 %v3840_v50, %v3840_v50 }
 0x383   :  { %6313 = vmatpush3.bf16.msra.mxu1 %v6909_v57 }
 0x384   :  { %6314 = vmatprep.subr.bf16.mxu1 %v6922_v40 }
 0x385   :  { %6299 = vmatpush3.bf16.msra.mxu0 %v6904_v31 }
 0x386   :  { %6300 = vmatprep.subr.bf16.mxu0 %v6922_v40 }
 0x387   :  { %6315 = vmatpush3.bf16.msra.mxu1 %v6910_v58 }
 0x388   :  { %6316 = vmatprep.subr.bf16.mxu1 %v6922_v40 }
 0x389   :  { %6301 = vmatpush3.bf16.msra.mxu0 %v6905_v59 }
 0x38a   :  { %6302 = vmatprep.subr.bf16.mxu0 %v6922_v40 }
 0x38b   :  { %6317 = vmatpush3.bf16.msra.mxu1 %v6911_v61 }
 0x38c   :  { %6318 = vmatprep.subr.bf16.mxu1 %v6922_v40 }
 0x38d   :  { %6303 = vmatpush3.bf16.msra.mxu0 %v6906_v32 }
 0x38e   :  { %6304 = vmatprep.subr.bf16.mxu0 %v6922_v40 }
 0x38f   :  { %6319 = vmatpush3.bf16.msra.mxu1 %v6912_v62 }
 0x390   :  { %6320 = vmatprep.subr.bf16.mxu1 %v6922_v40 }
 0x391   :  { %6305 = vmatpush3.bf16.msra.mxu0 %v6907_v42 }
 0x392   :  { %6330 = vmatprep.subr.bf16.mxu0 %v6922_v40 }
 0x393   :  { %6321 = vmatpush3.bf16.msra.mxu1 %v6913_v0 }
 0x394   :  { %6307 = vmatmul.mubr.msk.bf16.vlgmr.msra.gmra.mrb[56].mxu0 %vm3897_vm4, %v3845_v52  ;;  %6322 = vmatprep.subr.bf16.mxu1 %v6922_v40 }
 0x395   :  { %6342 = vmatprep.mubr.msk.bf16.mxu0 %vm6923_vm2, %v6922_v40  ;;  %6331 = vmatpush3.bf16.msra.mxu0 %v6916_v3 }
 0x396   :  { %6332 = vmatprep.subr.bf16.mxu0 %v6922_v40 }
 0x397   :  { %6323 = vmatpush3.bf16.msra.mxu1 %v6914_v1 }
 0x398   :  { %6324 = vmatprep.subr.bf16.mxu1 %v6922_v40 }
 0x399   :  { %6333 = vmatpush3.bf16.msra.mxu0 %v6917_v4 }
 0x39a   :  { %6334 = vmatprep.subr.bf16.mxu0 %v6922_v40 }
 0x39b   :  { %6325 = vmatpush3.bf16.msra.mxu1 %v4352_v2 }
 0x39d   :  { %6335 = vmatpush3.bf16.msra.mxu0 %v6918_v5 }
 0x39e   :  { %6336 = vmatprep.subr.bf16.mxu0 %v6922_v40 }
 0x3a1   :  { %6337 = vmatpush3.bf16.msra.mxu0 %v6919_v6 }
 0x3a2   :  { %6338 = vmatprep.subr.bf16.mxu0 %v6922_v40 }
 0x3a5   :  { %6339 = vmatpush3.bf16.msra.mxu0 %v6920_v38 }
 0x3a6   :  { %6340 = vmatprep.subr.bf16.mxu0 %v6922_v40  ;;  %v5143_v40 = vld [vmem:[%s8402_s10] ss:$0 sm:$0xff] }
 0x3a9   :  { %6341 = vmatpush3.bf16.msra.mxu0 %v4451_v41 }
 0x437   :  { %v4008_v7 = vpop.f32.mrb[48].mxu1 }
 0x438   :  { %v6266_v8 = vpop.f32.mrb[49].mxu1 }
 0x439   :  { %v4011_v9 = vpop.f32.mrb[50].mxu1 }
 0x43a   :  { %v6267_v12 = vpop.f32.mrb[51].mxu1 }
 0x43f   :  { %v3935_v13 = vpop.f32.mrb[48].mxu0 }
 0x440   :  { %v4009_v14 = vadd.f32 %v4008_v7, %v3935_v13  ;;  %v6252_v15 = vpop.f32.mrb[49].mxu0 }
 0x441   :  { %v3938_v24 = vpop.f32.mrb[50].mxu0 }
 0x442   :  { %v6253_v16 = vpop.f32.mrb[51].mxu0 }
 0x44f   :  { %v4177_v17 = vpop.f32.mrb[52].mxu1 }
 0x450   :  { %v6294_v18 = vpop.f32.mrb[53].mxu1 }
 0x451   :  { %v4180_v54 = vpop.f32.mrb[54].mxu1 }
 0x452   :  { %v6295_v19 = vpop.f32.mrb[55].mxu1 }
 0x453   :  { %v4092_v20 = vpop.f32.mrb[52].mxu0 }
 0x454   :  { %v4098_v26 = vadd.f32 %v4092_v20, %v4009_v14  ;;  %v6280_v27 = vpop.f32.mrb[53].mxu0 }
 0x455   :  { %v4095_v28 = vpop.f32.mrb[54].mxu0 }
 0x456   :  { %v6281_v10 = vpop.f32.mrb[55].mxu0  ;;  %v4183_v29 = vadd.f32 %v4177_v17, %v4098_v26 }
 0x467   :  { %v4262_v30 = vpop.f32.mrb[56].mxu0 }
 0x468   :  { %v4268_v25 = vadd.f32 %v4262_v30, %v4183_v29  ;;  %v6308_v55 = vpop.f32.mrb[57].mxu0 }
 0x469   :  { %v4265_v11 = vpop.f32.mrb[58].mxu0 }
 0x46a   :  { %v4276_v34 = vadd.f32 %v5132_v33, %v4268_v25  ;;  %v6309_v35 = vpop.f32.mrb[59].mxu0 }
 0x46c   :  { %v4277_v36 = vmax.f32 %v4276_v34, 0.0 }
 0x46e   :  { %v4278_v37 = vpack.c.bf16 %v4277_v36, %v4277_v36 }
 0x470   :  { %6327 = vmatmul.mubr.msk.bf16.vlgmr.msra.gmra.mrb[56].mxu1 %vm4346_vm6, %v4278_v37 }
 0x543   :  { %v4388_v44 = vpop.f32.mrb[56].mxu1 }
 0x544   :  { %v4389_v45 = vadd.f32 %v5133_v43, %v4388_v44  ;;  %v6328_v47 = vpop.f32.mrb[57].mxu1 }
 0x545   :  { %v4391_v48 = vpop.f32.mrb[58].mxu1 }
 0x546   :  { %v4394_v49 = vmax.f32 %v4389_v45, 0.0  ;;  %v6329_v53 = vpop.f32.mrb[59].mxu1 }
 0x548   :  { %v4395_v21 = vpack.c.bf16 %v4394_v49, %v4394_v49 }
 0x54a   :  { %6343 = vmatmul.mubr.msk.bf16.vlgmr.msra.gmra.mrb[60].mxu0 %vm2539_vm3, %v4395_v21 }
 0x61d   :  { %v4487_v23 = vpop.f32.mrb[60].mxu0 }
 0x61e   :  { %v4488_v56 = vadd.f32 %v5143_v40, %v4487_v23  ;;  %v6344_v46 = vpop.f32.mrb[61].mxu0 }
 0x61f   :  { %v4490_v22 = vpop.f32.mrb[62].mxu0 }
 0x620   :  { %4494 = vst.msk [vmem:[%s8403_s11] sm:$0xff] %vm4493_vm7, %v4488_v56  ;;  %v6345_v31 = vpop.f32.mrb[63].mxu0 }

</bundles_post_ra>
